<compile_context>
chip_gen: v6e
topology: v6e:2x2x1
jax: 0.10.0
libtpu: 0.0.40
codegen_flags: <defaults>
</compile_context>

<pallas_src>
import functools

import jax
import jax.numpy as jnp
from jax import lax
from jax.experimental import pallas as pl
from jax.experimental.pallas import tpu as pltpu


def bitchy_kernel(x_ref, w_enc_ref, w_dec_ref, b_enc_ref, b_dec_ref,
                  sse_ref, recon_ref, acts_ref, *, num_winners):
    x = x_ref[...]                                # (tm, d) f32
    b_enc = b_enc_ref[...]                        # (1, f)  f32
    b_dec = b_dec_ref[...]                        # (1, d)  f32
    mxu_dtype = w_enc_ref.dtype                   # bf16 (default) or f32

    # ---- encoder: raw[tm, f] = (x - b_dec) @ W_enc.T + b_enc
    x_cent = x - b_dec                            # f32 on VPU
    raw = lax.dot_general(
        x_cent.astype(mxu_dtype), w_enc_ref[...],
        (((1,), (1,)), ((), ())),
        preferred_element_type=jnp.float32) + b_enc          # (tm, f) f32

    # ---- top-k winners via k-th-value threshold.
    # k single XLU lane-max reductions (instead of max + argmin-of-where per
    # winner), then one vectorized select.  Exact match to torch.topk for
    # distinct row values; exact ties at the k-th value (measure zero for
    # float data) would admit extra winners.
    neg_inf = jnp.float32(-jnp.inf)
    work = raw
    kth = jnp.max(work, axis=-1, keepdims=True)
    for _ in range(num_winners - 1):
        work = jnp.where(work == kth, neg_inf, work)
        kth = jnp.max(work, axis=-1, keepdims=True)
    acts = jnp.where(raw >= kth, raw, jnp.float32(0.0))       # (tm, f) f32

    # ---- decoder: recon[tm, d] = acts @ W_dec + b_dec
    recon = jnp.dot(acts.astype(mxu_dtype), w_dec_ref[...],
                    preferred_element_type=jnp.float32) + b_dec

    # ---- per-row squared error (single lane reduce); the batch mean is
    # finished by the caller so this grid axis can stay "parallel".
    diff = recon - x
    sse_ref[...] = jnp.sum(diff * diff, axis=-1, keepdims=True)
    recon_ref[...] = recon.astype(recon_ref.dtype)
    acts_ref[...] = acts.astype(acts_ref.dtype)


def bitchy_forward(x, w_enc, w_dec, b_enc, b_dec, num_winners, *,
                   block_m=256, matmul_dtype=jnp.bfloat16):
    """Pallas implementation of BitchyNetwork.forward.

    x: (n, d) f32; W_enc/W_dec: (f, d); b_enc: (f,); b_dec: (d,).
    Returns (loss scalar, reconstructed_x (n, d), acts (n, f)).
    matmul_dtype controls the MXU input dtype (bf16 default, f32 for exact).
    """
    n, d = x.shape
    f = w_enc.shape[0]

    x = x.astype(jnp.float32)
    # Weights cast once here -> half the weight DMA / VMEM residency for bf16.
    w_enc_c = w_enc.astype(matmul_dtype)
    w_dec_c = w_dec.astype(matmul_dtype)
    b_enc2 = b_enc.reshape(1, f).astype(jnp.float32)
    b_dec2 = b_dec.reshape(1, d).astype(jnp.float32)

    # Batch tile: multiple of 8 sublanes (or the whole batch if it is tiny).
    tm = min(block_m, n)
    if n >= 8:
        tm = max(8, (tm // 8) * 8)
    n_tiles = pl.cdiv(n, tm)
    n_pad = n_tiles * tm
    if n_pad != n:
        x_in = jnp.zeros((n_pad, d), jnp.float32).at[:n].set(x)
    else:
        x_in = x

    wbytes = jnp.dtype(matmul_dtype).itemsize
    flops = 4 * n_pad * f * d                      # two matmuls, 2 flops/MAC
    bytes_accessed = (n_pad * d * 4                # x
                      + 2 * f * d * wbytes         # W_enc + W_dec
                      + (f + d) * 4                # biases
                      + n_pad * (d + f + 1) * 4)   # recon + acts + sse
    cost = pl.CostEstimate(flops=flops, transcendentals=0,
                           bytes_accessed=bytes_accessed)

    # VMEM budget: resident weights + biases, double-buffered activation
    # tiles, plus headroom for f32 intermediates (raw/work/acts).
    vmem_needed = 2 * (2 * f * d * wbytes + (f + d) * 4
                       + tm * (2 * d + f + 1) * 4) + (16 << 20)
    vmem_limit = int(min(100 << 20, max(32 << 20, vmem_needed)))

    kern = functools.partial(bitchy_kernel, num_winners=num_winners)
    sse, recon, acts = pl.pallas_call(
        kern,
        out_shape=(
            jax.ShapeDtypeStruct((n_pad, 1), jnp.float32),
            jax.ShapeDtypeStruct((n_pad, d), jnp.float32),
            jax.ShapeDtypeStruct((n_pad, f), jnp.float32),
        ),
        grid_spec=pltpu.PrefetchScalarGridSpec(
            num_scalar_prefetch=0,
            grid=(n_tiles,),
            in_specs=[
                pl.BlockSpec((tm, d), lambda i: (i, 0)),   # x tile
                pl.BlockSpec((f, d), lambda i: (0, 0)),    # W_enc (resident)
                pl.BlockSpec((f, d), lambda i: (0, 0)),    # W_dec (resident)
                pl.BlockSpec((1, f), lambda i: (0, 0)),    # b_enc (resident)
                pl.BlockSpec((1, d), lambda i: (0, 0)),    # b_dec (resident)
            ],
            out_specs=[
                pl.BlockSpec((tm, 1), lambda i: (i, 0)),   # per-row SSE
                pl.BlockSpec((tm, d), lambda i: (i, 0)),   # recon
                pl.BlockSpec((tm, f), lambda i: (i, 0)),   # acts
            ],
        ),
        compiler_params=pltpu.CompilerParams(
            dimension_semantics=("parallel",),
            vmem_limit_bytes=vmem_limit),
        cost_estimate=cost,
    )(x_in, w_enc_c, w_dec_c, b_enc2, b_dec2)

    loss = jnp.sum(sse[:n, 0]) / n
    return loss, recon[:n], acts[:n]


def reference_forward(x, w_enc, w_dec, b_enc, b_dec, num_winners,
                      matmul_dtype=jnp.float32):
    """Pure-JAX reference mirroring the PyTorch forward (optionally with the
    same bf16 matmul-input rounding as the kernel for apples-to-apples checks).
    """
    x_cent = x - b_dec
    raw = jnp.dot(x_cent.astype(matmul_dtype),
                  w_enc.astype(matmul_dtype).T,
                  preferred_element_type=jnp.float32) + b_enc
    _, idx = lax.top_k(raw, num_winners)
    mask = jnp.zeros_like(raw).at[
        jnp.arange(raw.shape[0])[:, None], idx].set(1.0)
    acts = mask * raw
    recon = jnp.dot(acts.astype(matmul_dtype),
                    w_dec.astype(matmul_dtype),
                    preferred_element_type=jnp.float32) + b_dec
    loss = jnp.mean(jnp.sum((recon - x) ** 2, axis=-1))
    return loss, recon, acts


if __name__ == "__main__":
    # Small shapes consistent with the module: batch n, width d, features f.
    n, d, f = 128, 128, 256
    num_winners = 8

    key = jax.random.PRNGKey(0)
    k_feat, k_x = jax.random.split(key)

    # _init_weights(): rows drawn from data, then L2-normalized; here we init
    # deterministically from a Gaussian and row-normalize.
    features = jax.random.normal(k_feat, (f, d), dtype=jnp.float32)
    features = features / jnp.linalg.norm(features, axis=-1, keepdims=True)
    w_enc = features               # W_enc = init_weights.clone()
    w_dec = features               # W_dec = init_weights.clone()
    b_enc = jnp.zeros((f,), dtype=jnp.float32)
    b_dec = jnp.zeros((d,), dtype=jnp.float32)

    x = jax.random.normal(k_x, (n, d), dtype=jnp.float32)

    # 1) Exact-path check: f32 MXU inputs vs. pure-f32 reference (tight tol).
    loss32, recon32, acts32 = bitchy_forward(
        x, w_enc, w_dec, b_enc, b_dec, num_winners,
        block_m=64, matmul_dtype=jnp.float32)
    jax.block_until_ready((loss32, recon32, acts32))
    lr, rr, ar = reference_forward(x, w_enc, w_dec, b_enc, b_dec, num_winners,
                                   matmul_dtype=jnp.float32)
    assert jnp.allclose(loss32, lr, rtol=1e-5, atol=1e-5)
    assert jnp.allclose(recon32, rr, rtol=1e-5, atol=1e-5)
    assert jnp.allclose(acts32, ar, rtol=1e-5, atol=1e-5)

    # 2) Default fast path: bf16 MXU inputs vs. a reference using the same
    #    bf16 input rounding (so winner selection matches deterministically).
    loss, recon, acts = bitchy_forward(
        x, w_enc, w_dec, b_enc, b_dec, num_winners, block_m=64)
    jax.block_until_ready((loss, recon, acts))
    lb, rb, ab = reference_forward(x, w_enc, w_dec, b_enc, b_dec, num_winners,
                                   matmul_dtype=jnp.bfloat16)
    assert jnp.allclose(loss, lb, rtol=1e-3, atol=1e-3)
    assert jnp.allclose(recon, rb, rtol=1e-3, atol=1e-3)
    assert jnp.allclose(acts, ab, rtol=1e-3, atol=1e-3)

    print("KERNEL_OK")
</pallas_src>

<mosaic_0001>
module attributes {stable_mosaic.version = 11 : i64} {
  func.func @bitchy_kernel(%arg0: i32, %arg1: memref<64x128xf32, #tpu.memory_space<vmem>>, %arg2: memref<256x128xf32, #tpu.memory_space<vmem>>, %arg3: memref<256x128xf32, #tpu.memory_space<vmem>>, %arg4: memref<1x256xf32, #tpu.memory_space<vmem>>, %arg5: memref<1x128xf32, #tpu.memory_space<vmem>>, %arg6: memref<64x1xf32, #tpu.memory_space<vmem>>, %arg7: memref<64x128xf32, #tpu.memory_space<vmem>>, %arg8: memref<64x256xf32, #tpu.memory_space<vmem>>) attributes {dimension_semantics = [#tpu.dimension_semantics<parallel>], iteration_bounds = array<i64: 2>, scalar_prefetch = 0 : i64, scratch_operands = 0 : i64, tpu.core_type = #tpu.core_type<tc>, window_params = [{transform_indices = @transform_0, window_bounds = array<i64: 64, 128>}, {pipeline_mode = #tpu.pipeline_mode<synchronous>, transform_indices = @transform_1, window_bounds = array<i64: 256, 128>}, {pipeline_mode = #tpu.pipeline_mode<synchronous>, transform_indices = @transform_2, window_bounds = array<i64: 256, 128>}, {pipeline_mode = #tpu.pipeline_mode<synchronous>, transform_indices = @transform_3, window_bounds = array<i64: 1, 256>}, {pipeline_mode = #tpu.pipeline_mode<synchronous>, transform_indices = @transform_4, window_bounds = array<i64: 1, 128>}, {transform_indices = @transform_5, window_bounds = array<i64: 64, 1>}, {transform_indices = @transform_6, window_bounds = array<i64: 64, 128>}, {transform_indices = @transform_7, window_bounds = array<i64: 64, 256>}]} {
    %c0 = arith.constant 0 : index
    %c0_0 = arith.constant 0 : index
    %0 = vector.load %arg1[%c0, %c0_0] : memref<64x128xf32, #tpu.memory_space<vmem>>, vector<64x128xf32>
    %c0_1 = arith.constant 0 : index
    %c0_2 = arith.constant 0 : index
    %1 = vector.load %arg4[%c0_1, %c0_2] : memref<1x256xf32, #tpu.memory_space<vmem>>, vector<1x256xf32>
    %c0_3 = arith.constant 0 : index
    %c0_4 = arith.constant 0 : index
    %2 = vector.load %arg5[%c0_3, %c0_4] : memref<1x128xf32, #tpu.memory_space<vmem>>, vector<1x128xf32>
    %3 = vector.broadcast %2 : vector<1x128xf32> to vector<64x128xf32>
    %4 = arith.subf %0, %3 : vector<64x128xf32>
    %c0_5 = arith.constant 0 : index
    %c0_6 = arith.constant 0 : index
    %5 = vector.load %arg2[%c0_5, %c0_6] : memref<256x128xf32, #tpu.memory_space<vmem>>, vector<256x128xf32>
    %cst = arith.constant dense<0.000000e+00> : vector<64x256xf32>
    %6 = tpu.matmul %4, %5, %cst {dimension_numbers = #tpu.dot_dimension_numbers<[1], [1], [0], [0], [0, 0, 1, 0], [], []>} : vector<64x128xf32>, vector<256x128xf32>, vector<64x256xf32> -> vector<64x256xf32>
    %7 = vector.broadcast %1 : vector<1x256xf32> to vector<64x256xf32>
    %8 = arith.addf %6, %7 : vector<64x256xf32>
    %cst_7 = arith.constant dense<0xFF800000> : vector<64xf32>
    %9 = vector.multi_reduction <maximumf>, %8, %cst_7 [1] : vector<64x256xf32> to vector<64xf32>
    %10 = vector.shape_cast %9 : vector<64xf32> to vector<64x1xf32>
    %11 = vector.broadcast %10 : vector<64x1xf32> to vector<64x256xf32>
    %12 = arith.cmpf oeq, %8, %11 : vector<64x256xf32>
    %cst_8 = arith.constant 0xFF800000 : f32
    %13 = vector.broadcast %cst_8 : f32 to vector<64x256xf32>
    %14 = arith.select %12, %13, %8 : vector<64x256xi1>, vector<64x256xf32>
    %cst_9 = arith.constant dense<0xFF800000> : vector<64xf32>
    %15 = vector.multi_reduction <maximumf>, %14, %cst_9 [1] : vector<64x256xf32> to vector<64xf32>
    %16 = vector.shape_cast %15 : vector<64xf32> to vector<64x1xf32>
    %17 = vector.broadcast %16 : vector<64x1xf32> to vector<64x256xf32>
    %18 = arith.cmpf oeq, %14, %17 : vector<64x256xf32>
    %cst_10 = arith.constant 0xFF800000 : f32
    %19 = vector.broadcast %cst_10 : f32 to vector<64x256xf32>
    %20 = arith.select %18, %19, %14 : vector<64x256xi1>, vector<64x256xf32>
    %cst_11 = arith.constant dense<0xFF800000> : vector<64xf32>
    %21 = vector.multi_reduction <maximumf>, %20, %cst_11 [1] : vector<64x256xf32> to vector<64xf32>
    %22 = vector.shape_cast %21 : vector<64xf32> to vector<64x1xf32>
    %23 = vector.broadcast %22 : vector<64x1xf32> to vector<64x256xf32>
    %24 = arith.cmpf oeq, %20, %23 : vector<64x256xf32>
    %cst_12 = arith.constant 0xFF800000 : f32
    %25 = vector.broadcast %cst_12 : f32 to vector<64x256xf32>
    %26 = arith.select %24, %25, %20 : vector<64x256xi1>, vector<64x256xf32>
    %cst_13 = arith.constant dense<0xFF800000> : vector<64xf32>
    %27 = vector.multi_reduction <maximumf>, %26, %cst_13 [1] : vector<64x256xf32> to vector<64xf32>
    %28 = vector.shape_cast %27 : vector<64xf32> to vector<64x1xf32>
    %29 = vector.broadcast %28 : vector<64x1xf32> to vector<64x256xf32>
    %30 = arith.cmpf oeq, %26, %29 : vector<64x256xf32>
    %cst_14 = arith.constant 0xFF800000 : f32
    %31 = vector.broadcast %cst_14 : f32 to vector<64x256xf32>
    %32 = arith.select %30, %31, %26 : vector<64x256xi1>, vector<64x256xf32>
    %cst_15 = arith.constant dense<0xFF800000> : vector<64xf32>
    %33 = vector.multi_reduction <maximumf>, %32, %cst_15 [1] : vector<64x256xf32> to vector<64xf32>
    %34 = vector.shape_cast %33 : vector<64xf32> to vector<64x1xf32>
    %35 = vector.broadcast %34 : vector<64x1xf32> to vector<64x256xf32>
    %36 = arith.cmpf oeq, %32, %35 : vector<64x256xf32>
    %cst_16 = arith.constant 0xFF800000 : f32
    %37 = vector.broadcast %cst_16 : f32 to vector<64x256xf32>
    %38 = arith.select %36, %37, %32 : vector<64x256xi1>, vector<64x256xf32>
    %cst_17 = arith.constant dense<0xFF800000> : vector<64xf32>
    %39 = vector.multi_reduction <maximumf>, %38, %cst_17 [1] : vector<64x256xf32> to vector<64xf32>
    %40 = vector.shape_cast %39 : vector<64xf32> to vector<64x1xf32>
    %41 = vector.broadcast %40 : vector<64x1xf32> to vector<64x256xf32>
    %42 = arith.cmpf oeq, %38, %41 : vector<64x256xf32>
    %cst_18 = arith.constant 0xFF800000 : f32
    %43 = vector.broadcast %cst_18 : f32 to vector<64x256xf32>
    %44 = arith.select %42, %43, %38 : vector<64x256xi1>, vector<64x256xf32>
    %cst_19 = arith.constant dense<0xFF800000> : vector<64xf32>
    %45 = vector.multi_reduction <maximumf>, %44, %cst_19 [1] : vector<64x256xf32> to vector<64xf32>
    %46 = vector.shape_cast %45 : vector<64xf32> to vector<64x1xf32>
    %47 = vector.broadcast %46 : vector<64x1xf32> to vector<64x256xf32>
    %48 = arith.cmpf oeq, %44, %47 : vector<64x256xf32>
    %cst_20 = arith.constant 0xFF800000 : f32
    %49 = vector.broadcast %cst_20 : f32 to vector<64x256xf32>
    %50 = arith.select %48, %49, %44 : vector<64x256xi1>, vector<64x256xf32>
    %cst_21 = arith.constant dense<0xFF800000> : vector<64xf32>
    %51 = vector.multi_reduction <maximumf>, %50, %cst_21 [1] : vector<64x256xf32> to vector<64xf32>
    %52 = vector.shape_cast %51 : vector<64xf32> to vector<64x1xf32>
    %53 = vector.broadcast %52 : vector<64x1xf32> to vector<64x256xf32>
    %54 = arith.cmpf oge, %8, %53 : vector<64x256xf32>
    %cst_22 = arith.constant 0.000000e+00 : f32
    %55 = vector.broadcast %cst_22 : f32 to vector<64x256xf32>
    %56 = arith.select %54, %8, %55 : vector<64x256xi1>, vector<64x256xf32>
    %c0_23 = arith.constant 0 : index
    %c0_24 = arith.constant 0 : index
    %57 = vector.load %arg3[%c0_23, %c0_24] : memref<256x128xf32, #tpu.memory_space<vmem>>, vector<256x128xf32>
    %cst_25 = arith.constant dense<0.000000e+00> : vector<64x128xf32>
    %58 = tpu.matmul %56, %57, %cst_25 {dimension_numbers = #tpu.dot_dimension_numbers<[1], [0], [0], [1], [0, 0, 1, 1], [], []>} : vector<64x256xf32>, vector<256x128xf32>, vector<64x128xf32> -> vector<64x128xf32>
    %59 = vector.broadcast %2 : vector<1x128xf32> to vector<64x128xf32>
    %60 = arith.addf %58, %59 : vector<64x128xf32>
    %61 = arith.subf %60, %0 : vector<64x128xf32>
    %62 = arith.mulf %61, %61 : vector<64x128xf32>
    %cst_26 = arith.constant dense<0.000000e+00> : vector<64xf32>
    %63 = vector.multi_reduction <add>, %62, %cst_26 [1] : vector<64x128xf32> to vector<64xf32>
    %64 = vector.shape_cast %63 : vector<64xf32> to vector<64x1xf32>
    %c0_27 = arith.constant 0 : index
    %c0_28 = arith.constant 0 : index
    %65 = vector.load %arg6[%c0_27, %c0_28] : memref<64x1xf32, #tpu.memory_space<vmem>>, vector<64x1xf32>
    tpu.vector_store %arg6[%c0_27, %c0_28], %64 {strides = array<i32>} : memref<64x1xf32, #tpu.memory_space<vmem>>, vector<64x1xf32>,
    %c0_29 = arith.constant 0 : index
    %c0_30 = arith.constant 0 : index
    %66 = vector.load %arg7[%c0_29, %c0_30] : memref<64x128xf32, #tpu.memory_space<vmem>>, vector<64x128xf32>
    tpu.vector_store %arg7[%c0_29, %c0_30], %60 {strides = array<i32>} : memref<64x128xf32, #tpu.memory_space<vmem>>, vector<64x128xf32>,
    %c0_31 = arith.constant 0 : index
    %c0_32 = arith.constant 0 : index
    %67 = vector.load %arg8[%c0_31, %c0_32] : memref<64x256xf32, #tpu.memory_space<vmem>>, vector<64x256xf32>
    tpu.vector_store %arg8[%c0_31, %c0_32], %56 {strides = array<i32>} : memref<64x256xf32, #tpu.memory_space<vmem>>, vector<64x256xf32>,
    return
  }
  func.func @transform_0(%arg0: i32) -> (i32, i32) {
    %c0_i32 = arith.constant 0 : i32
    %c0_i32_0 = arith.constant 0 : i32
    return %arg0, %c0_i32 : i32, i32
  }
  func.func @transform_1(%arg0: i32) -> (i32, i32) {
    %c0_i32 = arith.constant 0 : i32
    %c0_i32_0 = arith.constant 0 : i32
    %c0_i32_1 = arith.constant 0 : i32
    return %c0_i32, %c0_i32_0 : i32, i32
  }
  func.func @transform_2(%arg0: i32) -> (i32, i32) {
    %c0_i32 = arith.constant 0 : i32
    %c0_i32_0 = arith.constant 0 : i32
    %c0_i32_1 = arith.constant 0 : i32
    return %c0_i32, %c0_i32_0 : i32, i32
  }
  func.func @transform_3(%arg0: i32) -> (i32, i32) {
    %c0_i32 = arith.constant 0 : i32
    %c0_i32_0 = arith.constant 0 : i32
    %c0_i32_1 = arith.constant 0 : i32
    return %c0_i32, %c0_i32_0 : i32, i32
  }
  func.func @transform_4(%arg0: i32) -> (i32, i32) {
    %c0_i32 = arith.constant 0 : i32
    %c0_i32_0 = arith.constant 0 : i32
    %c0_i32_1 = arith.constant 0 : i32
    return %c0_i32, %c0_i32_0 : i32, i32
  }
  func.func @transform_5(%arg0: i32) -> (i32, i32) {
    %c0_i32 = arith.constant 0 : i32
    %c0_i32_0 = arith.constant 0 : i32
    return %arg0, %c0_i32 : i32, i32
  }
  func.func @transform_6(%arg0: i32) -> (i32, i32) {
    %c0_i32 = arith.constant 0 : i32
    %c0_i32_0 = arith.constant 0 : i32
    return %arg0, %c0_i32 : i32, i32
  }
  func.func @transform_7(%arg0: i32) -> (i32, i32) {
    %c0_i32 = arith.constant 0 : i32
    %c0_i32_0 = arith.constant 0 : i32
    return %arg0, %c0_i32 : i32, i32
  }
}

</mosaic_0001>

<bundles_post_ra>
// kernel: tpu_custom_call.1
= control target key start
LH: loop header
LB: loop body
LE: loop exit
PB: predicated region body
PF: predicated region fallthrough
CT: control target
= control target key end

     0   :  { %s2367_s0 = inlined_call_operand.hbm [shape: f32[128,128], index: 0, kind: input, shape index: {}]   ;;  %s2368_s1 = inlined_call_operand.hbm [shape: f32[256,128], index: 1, kind: input, shape index: {}]   ;;  %s2369_s2 = inlined_call_operand.hbm [shape: f32[256,128], index: 2, kind: input, shape index: {}]   ;;  %s2370_s3 = inlined_call_operand.vmem [shape: f32[1,256], index: 3, kind: input, shape index: {}]   ;;  %s2371_s4 = inlined_call_operand.vmem [shape: f32[1,128], index: 4, kind: input, shape index: {}]   ;;  %s2372_s5 = inlined_call_operand.vmem [shape: f32[128,1], index: 5, kind: output, shape index: {0}]   ;;  %s2373_s6 = inlined_call_operand.hbm [shape: f32[128,128], index: 6, kind: output, shape index: {1}]   ;;  %s2374_s7 = inlined_call_operand.hbm [shape: f32[128,256], index: 7, kind: output, shape index: {2}]  }
   0x1   :  { %2381 = sst [smem:[#allocation15_spill]] %s2368_s1 }
   0x2   :  { %13 = vsyncpa [#allocation3], 0 }
   0x3   :  { %15 = vsyncpa [#allocation3 + $0x1], 0 }
   0x4   :  { %16 = vsyncpa [#allocation6], 0 }
   0x5   :  { %17 = vsyncpa [#allocation4], 0 }
   0x6   :  { %19 = vsyncpa [#allocation4 + $0x1], 0 }
   0x7   :  { %20 = vsyncpa [#allocation10], 0 }
   0x8   :  { %22 = vsyncpa [#allocation10 + $0x1], 0  ;;  %s1845_s24 = smov 0   ;;  %s1847_s25 = smov 0  }
   0x9   :  { %s1849_s26 = smov 0   ;;  %s1851_s27 = smov 0  }
   0xa LB: > { %s1866_s28 = sadd.s32 4294967295, %s1792_s27   ;;  %s1377_s29 = sadd.s32 4294967294, %s1792_s27   ;;  %s1792_s27 = sphi %s1851_s27, %s2401_s27   ;;  %s1788_s26 = sphi %s1849_s26, %s2400_s26   ;;  %s1784_s25 = sphi %s1847_s25, %s2399_s25   ;;  %s1780_s24 = sphi %s1845_s24, %s2398_s24  }
   0xb   : > { %p48_p0 = scmp.ne.s32.totalorder %s1784_s25, %s1780_s24  ;;  %p2376_p1 = scmp.eq.s32.totalorder %s1866_s28, 0 }
   0xc   : > { %p182_p2 = scmp.eq.s32.totalorder %s1866_s28, 1  ;;  %p188_p3 = scmp.eq.s32.totalorder %s1377_s29, 1 }
   0xd   : > { %p1875_p4 = por %p2376_p1, %p48_p0  ;;  %p1378_p5 = scmp.ge.s32.totalorder %s1792_s27, 1 }
   0xe   : > { %p1880_p6 = por %p188_p3, %p48_p0  ;;  %p221_p7 = scmp.lt.s32.totalorder %s1792_s27, 3 }
   0xf   : > { %s2382_s30 = scalar_select %p1875_p4, 1, 0 }
  0x10   : > { %s2383_s8 = scalar_select %p1880_p6, 1, 0 }
  0x11   : > { %p1885_p8 = pnand %p1378_p5, %p221_p7  ;;  %s1794_s10 = smov [#allocation5]  }
  0x12   : > { %s233_s11 = sshll.u32 %s1794_s10, 4  ;;  %s1795_s13 = smov [#allocation7]   ;;  %s234_s11 = int_to_ptr.vmem [resolvable:$true] %s233_s11 }
  0x13   : > { %s2384_s9 = scalar_select %p1885_p8, 1, 0 }
  0x14   : > { %p1541_p9 = pneg %p1885_p8  ;;  %s246_s14 = sshll.u32 %s1795_s13, 4  ;;  %s247_s14 = int_to_ptr.vmem [resolvable:$true] %s246_s14 }
  0x15   : > { %s1625_s15 = scalar_lea.vmem %s234_s11, 4096  ;;  %p1633_p5 = scmp.lt.s32.totalorder %s234_s11, %s234_s11 }
  0x16   : > { %p1894_p11 = pnand %p1541_p9, %p2376_p1  ;;  %p1626_p13 = scmp.ne.s32.totalorder %s234_s11, %s1625_s15 }
  0x17   : > { %p1634_p7 = scmp.lt.s32.totalorder %s1625_s15, %s1625_s15 }
  0x18   : > { %p1616_p12 = pneg %p1894_p11 }
  0x19   : > { %p1635_p10 = por %p1634_p7, %p1633_p5 }
  0x1a   : > { %p1628_p0 = pnand %p1626_p13, %p1616_p12 }
  0x1c   : > { %p1629_p3 = pneg %p1628_p0 }
  0x1e   : > { %p1636_p9 = pnand %p1635_p10, %p1629_p3 }
  0x20   : > { %1639 = shalt.err (!%p1636_p9)
}
  0x21   : > { %s2375_s16 = smov 128   ;;  %s2377_s17 = smov 8  }
  0x22   : > { %s2386_s1 = sld [smem:[#allocation15_spill]]  ;;  %s1651_s20 = scalar_lea.vmem %s247_s14, 4096 }
  0x23   : > { %p1652_p13 = scmp.ne.s32.totalorder %s247_s14, %s1651_s20  ;;  %p1659_p10 = scmp.lt.s32.totalorder %s247_s14, %s247_s14 }
  0x24   : > { %p1660_p3 = scmp.lt.s32.totalorder %s1651_s20, %s1651_s20 }
  0x25   : > { %p1654_p0 = pnand %p1652_p13, %p1616_p12 }
  0x26   : > { %p1661_p7 = por %p1660_p3, %p1659_p10 }
  0x27   : > { %p1655_p5 = pneg %p1654_p0 }
  0x28   : > { %1544 = dma.hbm_to_vmem [thread:$0]  (!%p1894_p11), %s2386_s1, 4096, %s234_s11, [#allocation6], %s2375_s16, %s2375_s16, %s2377_s17  }
  0x29   : > { %p1662_p9 = pnand %p1661_p7, %p1655_p5 }
  0x2b   : > { %1665 = shalt.err (!%p1662_p9)
}
  0x2c   : > { %1547 = dma.hbm_to_vmem [thread:$0]  (!%p1894_p11), %s2369_s2, 4096, %s247_s14, [#allocation6], %s2375_s16, %s2375_s16, %s2377_s17  }
  0x2d   : > { %s1923_s23 = sadd.s32 1, %s1792_s27   ;;  %s35_s29 = sadd.s32 1, %s1788_s26 }
  0x2e   : > { %s32_s10 = ssub.s32 %s1792_s27, %s1923_s23  ;;  %p42_p12 = scmp.ne.s32.totalorder %s1788_s26, %s1784_s25 }
  0x2f   : > { %p33_p13 = scmp.eq.s32.totalorder %s32_s10, 0  ;;  %p43_p0 = scmp.eq.s32.totalorder %s1792_s27, 0 }
  0x30   : > { %p1933_p5 = por %p182_p2, %p42_p12  ;;  %p1561_p10 = scmp.lt.s32.totalorder %s1792_s27, 2 }
  0x31   : > { %s1939_s12 = scalar_select %p33_p13, %s1788_s26, %s35_s29  }
  0x32   : > { %s2387_s11 = scalar_select %p1933_p5, 1, 0 }
  0x33   : > { %p44_p3 = por %p43_p0, %p42_p12  ;;  %s266_s13 = sand.u32 1, %s1788_s26  }
  0x34   : > { %s1382_s15 = sshll.u32 %s266_s13, 6  ;;  %s1419_s14 = sshll.u32 %s1792_s27, 10 }
  0x35   : > { %s1946_s20 = scalar_lea.hbm %s2367_s0, %s1419_s14  ;;  %s270_s21 = scalar_lea.vmem [#allocation2], %s1382_s15 }
  0x36   : > { %s277_s22 = sshll.u32 %s270_s21, 4  ;;  %p1950_p2 = pnand %p1561_p10, %p44_p3  ;;  %s1948_s22 = int_to_ptr.vmem [resolvable:$true] %s277_s22 }
  0x37   : > { %s1954_s29 = scalar_lea.sflag [#allocation3], %s266_s13  ;;  %s1666_s16 = scalar_lea.hbm %s1946_s20, 1024 }
  0x38   : > { %p1667_p11 = scmp.ne.s32.totalorder %s1946_s20, %s1666_s16  ;;  %p1668_p7 = pneg %p1950_p2 }
  0x39   : > { %s1671_s15 = scalar_lea.hbm %s2367_s0, 2048  ;;  %p1672_p13 = scmp.lt.s32.totalorder %s1946_s20, %s2367_s0 }
  0x3a   : > { %p1669_p9 = pnand %p1668_p7, %p1667_p11  ;;  %p1673_p0 = scmp.lt.s32.totalorder %s1671_s15, %s1666_s16 }
  0x3c   : > { %p1670_p12 = pneg %p1669_p9  ;;  %p1674_p10 = por %p1673_p0, %p1672_p13 }
  0x3e   : > { %p1675_p3 = pnand %p1674_p10, %p1670_p12 }
  0x40   : > { %1678 = shalt.err (!%p1675_p3)
}
  0x41   : > { %s1679_s13 = scalar_lea.vmem %s1948_s22, 1024  ;;  %s1798_s17 = smov [#allocation2]  }
  0x42   : > { %p1680_p1 = scmp.ne.s32.totalorder %s1948_s22, %s1679_s13  ;;  %s1684_s1 = sshll.u32 %s1798_s17, 4  ;;  %s1685_s1 = int_to_ptr.vmem [resolvable:$false] %s1684_s1 }
  0x43   : > { %s1686_s14 = scalar_lea.vmem %s1685_s1, 2048  ;;  %p1687_p9 = scmp.lt.s32.totalorder %s1948_s22, %s1685_s1 }
  0x44   : > { %p1682_p6 = pnand %p1680_p1, %p1668_p7  ;;  %p1688_p5 = scmp.lt.s32.totalorder %s1686_s14, %s1679_s13 }
  0x46   : > { %p1683_p11 = pneg %p1682_p6  ;;  %p1689_p4 = por %p1688_p5, %p1687_p9 }
  0x48   : > { %p1690_p8 = pnand %p1689_p4, %p1683_p11 }
  0x4a   : > { %1693 = shalt.err (!%p1690_p8)
}
  0x4b   : > { %s2389_s16 = smov 8   ;;  %s2390_s18 = smov 128  }
  0x4c   : > { %1551 = dma.hbm_to_vmem [thread:$0]  (!%p1950_p2), %s1946_s20, 1024, %s1948_s22, %s1954_s29, %s2390_s18, %s2390_s18, %s2389_s16  }
  0x4d   : > { %p2391_p1 = scmp.ne.s32.totalorder %s2384_s9, 0 }
  0x4e   : > { %s1981_s17 = sand.u32 (!%p2391_p1), 1, %s1784_s25   ;;  %p2392_p4 = scmp.ne.s32.totalorder (!%p2391_p1), %s2382_s30, 0 }
  0x4f   : > { %289 = sbr.rel (%p2391_p1) target bundleno = 1856 (0x740), region = 40  ;;  %s1386_s1 = sshll.u32 (!%p2391_p1), %s1981_s17, 6 }
  0x50   : > { %s292_s15 = scalar_lea.sflag (!%p2391_p1), [#allocation3], %s1981_s17  ;;  %s1987_s10 = scalar_lea.vmem (!%p2391_p1), [#allocation2], %s1386_s1 }
  0x54   : > { %1763 = dma.done.wait (%p2392_p4), %s292_s15, 1024  }
  0x55   : > { %1765 = vsyncadd (%p2392_p4), %s292_s15, 4294966272  ;;  %p2393_p6 = scmp.eq.s32.totalorder %s1866_s28, 0 }
  0x57   : > { %1767 = dma.done.wait (%p2393_p6), [#allocation6], 8192   ;;  %p2394_p8 = pmov %p2393_p6 }
  0x58   : > { %v408_v0 = vld [vmem:[#allocation5 + $0xf8] sm:$0xff]  ;;  %v407_v2 = vld [vmem:[#allocation5 + $0xf0] sm:$0xff]  ;;  %v406_v4 = vld [vmem:[#allocation5 + $0xe8] sm:$0xff]  ;;  %v410_v49 = vlaneseq  ;;  %s1390_s29 = sshll.u32 %s1981_s17, 7  ;;  %s2253_s14 = scalar_lea.vmem [#allocation8], %s1386_s1 }
  0x59   : > { %1769 = vsyncadd (%p2394_p8), [#allocation6], 4294959104  ;;  %v392_v1 = vld [vmem:[#allocation5 + $0x78] sm:$0xff]  ;;  %1423 = vmatprep.subr.mxu0 %v408_v0  ;;  %v391_v3 = vld [vmem:[#allocation5 + $0x70] sm:$0xff]  ;;  %s2187_s19 = scalar_lea.vmem [#allocation9], %s1390_s29  ;;  %s1211_s16 = sshll.u32 %s2253_s14, 4  ;;  %s2272_s16 = int_to_ptr.vmem [resolvable:$true] %s1211_s16 }
  0x5a   : > { %1424 = vmatpush3.xpose.msra.mxu0 %v392_v1  ;;  %v390_v5 = vld [vmem:[#allocation5 + $0x68] sm:$0xff]  ;;  %v405_v6 = vld [vmem:[#allocation5 + $0xe0] sm:$0xff]  ;;  %v404_v10 = vld [vmem:[#allocation5 + $0xd8] sm:$0xff]  ;;  %v411_v50 = vshrl.u32 %v410_v49, 7  ;;  %s1420_s18 = sshll.u32 %s1866_s28, 10  ;;  %s1422_s1 = sshll.u32 %s1866_s28, 11 }
  0x5b   : > { %1425 = vmatprep.subr.mxu0 %v407_v2  ;;  %v353_v7 = vld [vmem:[%s1987_s10] sm:$0xff]  ;;  %v388_v12 = vld [vmem:[#allocation5 + $0x58] sm:$0xff]  ;;  %v403_v13 = vld [vmem:[#allocation5 + $0xd0] sm:$0xff]  ;;  %s2279_s9 = scalar_lea.hbm %s2373_s6, %s1420_s18  ;;  %s1189_s20 = scalar_lea.sflag [#allocation4], %s1981_s17 }
  0x5c   : > { %v389_v8 = vld [vmem:[#allocation5 + $0x60] sm:$0xff]  ;;  %v387_v14 = vld [vmem:[#allocation5 + $0x50] sm:$0xff]  ;;  %v402_v15 = vld [vmem:[#allocation5 + $0xc8] sm:$0xff]  ;;  %v412_v51 = vsub.s32 0, %v411_v50  ;;  %v416_v52 = vsub.s32 1, %v411_v50  ;;  %s1694_s22 = scalar_lea.vmem %s2272_s16, 1024 }
  0x5d   : > { %v2001_v9 = vld [vmem:[%s2371_s4] ss:$0 sm:$0xff]  ;;  %v386_v16 = vld [vmem:[#allocation5 + $0x48] sm:$0xff]  ;;  %v400_v19 = vld [vmem:[#allocation5 + $0xb8] sm:$0xff]  ;;  %p1695_p5 = scmp.ne.s32.totalorder %s2272_s16, %s1694_s22  ;;  %p2395_p2 = scmp.ne.s32.totalorder %s2387_s11, 0 }
  0x5e   : > { %1426 = vmatpush3.xpose.msra.mxu0 %v391_v3  ;;  %v369_v11 = vsub.f32 %v353_v7, %v2001_v9  ;;  %v401_v17 = vld [vmem:[#allocation5 + $0xc0] sm:$0xff]  ;;  %v384_v20 = vld [vmem:[#allocation5 + $0x38] sm:$0xff]  ;;  %v399_v21 = vld [vmem:[#allocation5 + $0xb0] sm:$0xff] }
  0x5f   : > { %1427 = vmatprep.subr.mxu0 %v406_v4  ;;  %v385_v18 = vld [vmem:[#allocation5 + $0x40] sm:$0xff]  ;;  %v383_v22 = vld [vmem:[#allocation5 + $0x30] sm:$0xff]  ;;  %v398_v23 = vld [vmem:[#allocation5 + $0xa8] sm:$0xff]  ;;  %p1696_p7 = pnand %p1695_p5, %p2395_p2 }
  0x60   : > { %1455 = vmatprep.mubr.f32.mxu0 %v369_v11  ;;  %v382_v24 = vld [vmem:[#allocation5 + $0x28] sm:$0xff]  ;;  %v397_v25 = vld [vmem:[#allocation5 + $0xa0] sm:$0xff]  ;;  %v396_v27 = vld [vmem:[#allocation5 + $0x98] sm:$0xff] }
  0x61   : > { %v381_v26 = vld [vmem:[#allocation5 + $0x20] sm:$0xff]  ;;  %v380_v28 = vld [vmem:[#allocation5 + $0x18] sm:$0xff]  ;;  %v395_v29 = vld [vmem:[#allocation5 + $0x90] sm:$0xff]  ;;  %p1697_p12 = pneg %p1696_p7 }
  0x62   : > { %1428 = vmatpush3.xpose.msra.mxu0 %v390_v5  ;;  %v379_v30 = vld [vmem:[#allocation5 + $0x10] sm:$0xff]  ;;  %v394_v31 = vld [vmem:[#allocation5 + $0x88] sm:$0xff]  ;;  %v393_v33 = vld [vmem:[#allocation5 + $0x80] sm:$0xff] }
  0x63   : > { %1429 = vmatprep.subr.mxu0 %v405_v6  ;;  %v378_v32 = vld [vmem:[#allocation5 + $0x8] sm:$0xff]  ;;  %v377_v34 = vld [vmem:[#allocation5] sm:$0xff]  ;;  %v355_v37 = vld [vmem:[%s1987_s10 + $0x10] sm:$0xff] }
  0x64   : > { %v354_v35 = vld [vmem:[%s1987_s10 + $0x8] sm:$0xff]  ;;  %v371_v38 = vsub.f32 %v355_v37, %v2001_v9  ;;  %v356_v39 = vld [vmem:[%s1987_s10 + $0x18] sm:$0xff]  ;;  %v357_v41 = vld [vmem:[%s1987_s10 + $0x20] sm:$0xff] }
  0x65   : > { %v370_v36 = vsub.f32 %v354_v35, %v2001_v9  ;;  %v372_v40 = vsub.f32 %v356_v39, %v2001_v9  ;;  %v373_v42 = vsub.f32 %v357_v41, %v2001_v9  ;;  %v358_v43 = vld [vmem:[%s1987_s10 + $0x28] sm:$0xff]  ;;  %v359_v45 = vld [vmem:[%s1987_s10 + $0x30] sm:$0xff]  ;;  %v360_v47 = vld [vmem:[%s1987_s10 + $0x38] sm:$0xff] }
  0x66   : > { %1430 = vmatpush3.xpose.msra.mxu0 %v389_v8  ;;  %v374_v44 = vsub.f32 %v358_v43, %v2001_v9  ;;  %v375_v46 = vsub.f32 %v359_v45, %v2001_v9  ;;  %v376_v48 = vsub.f32 %v360_v47, %v2001_v9  ;;  %v361_v53 = vld [vmem:[%s2370_s3] sm:$0x3] }
  0x67   : > { %1431 = vmatprep.subr.mxu0 %v404_v10  ;;  %v413_v54 = vrot.slane %v361_v53, %v412_v51  ;;  %v417_v55 = vrot.slane %v361_v53, %v416_v52 }
  0x6a   : > { %1432 = vmatpush3.xpose.msra.mxu0 %v388_v12 }
  0x6b   : > { %1433 = vmatprep.subr.mxu0 %v403_v13 }
  0x6e   : > { %1434 = vmatpush3.xpose.msra.mxu0 %v387_v14 }
  0x6f   : > { %1435 = vmatprep.subr.mxu0 %v402_v15 }
  0x72   : > { %1436 = vmatpush3.xpose.msra.mxu0 %v386_v16 }
  0x73   : > { %1437 = vmatprep.subr.mxu0 %v401_v17 }
  0x76   : > { %1438 = vmatpush3.xpose.msra.mxu0 %v385_v18 }
  0x77   : > { %1439 = vmatprep.subr.mxu0 %v400_v19 }
  0x7a   : > { %1440 = vmatpush3.xpose.msra.mxu0 %v384_v20 }
  0x7b   : > { %1441 = vmatprep.subr.mxu0 %v399_v21 }
  0x7e   : > { %1442 = vmatpush3.xpose.msra.mxu0 %v383_v22 }
  0x7f   : > { %1443 = vmatprep.subr.mxu0 %v398_v23 }
  0x82   : > { %1444 = vmatpush3.xpose.msra.mxu0 %v382_v24 }
  0x83   : > { %1445 = vmatprep.subr.mxu0 %v397_v25 }
  0x86   : > { %1446 = vmatpush3.xpose.msra.mxu0 %v381_v26 }
  0x87   : > { %1447 = vmatprep.subr.mxu0 %v396_v27 }
  0x8a   : > { %1448 = vmatpush3.xpose.msra.mxu0 %v380_v28 }
  0x8b   : > { %1449 = vmatprep.subr.mxu0 %v395_v29 }
  0x8e   : > { %1450 = vmatpush3.xpose.msra.mxu0 %v379_v30 }
  0x8f   : > { %1451 = vmatprep.subr.mxu0 %v394_v31 }
  0x92   : > { %1452 = vmatpush3.xpose.msra.mxu0 %v378_v32 }
  0x93   : > { %1453 = vmatprep.subr.mxu0 %v393_v33 }
  0x96   : > { %1454 = vmatpush3.xpose.msra.mxu0 %v377_v34 }
  0x99   : > { %1456 = vmatmul.mubr.f32.vlgmr.msra.gmra.mxu0 %v369_v11 }
  0x9a   : > { %1457 = vmatprep.mubr.f32.mxu0 %v370_v36 }
  0x9d   : > { %1458 = vmatmul.mubr.f32.gmra.mxu0 %v370_v36 }
  0x9e   : > { %1459 = vmatprep.mubr.f32.mxu0 %v371_v38 }
  0xa1   : > { %1460 = vmatmul.mubr.f32.gmra.mxu0 %v371_v38 }
  0xa2   : > { %1461 = vmatprep.mubr.f32.mxu0 %v372_v40 }
  0xa5   : > { %1462 = vmatmul.mubr.f32.gmra.mxu0 %v372_v40 }
  0xa6   : > { %1463 = vmatprep.mubr.f32.mxu0 %v373_v42 }
  0xa9   : > { %1464 = vmatmul.mubr.f32.gmra.mxu0 %v373_v42 }
  0xaa   : > { %1465 = vmatprep.mubr.f32.mxu0 %v374_v44 }
  0xad   : > { %1466 = vmatmul.mubr.f32.gmra.mxu0 %v374_v44 }
  0xae   : > { %1467 = vmatprep.mubr.f32.mxu0 %v375_v46 }
  0xb1   : > { %1468 = vmatmul.mubr.f32.gmra.mxu0 %v375_v46 }
  0xb2   : > { %1469 = vmatprep.mubr.f32.mxu0 %v376_v48 }
  0xb5   : > { %1470 = vmatmul.mubr.f32.gmra.mxu0 %v376_v48 }
 0x159   : > { %v486_v56 = vpop.f32.mrf.mxu0 }
 0x15a   : > { %v2021_v58 = vadd.f32 %v486_v56, %v413_v54 }
 0x15b   : > { %v488_v57 = vpop.f32.mrf.mxu0 }
 0x15c   : > { %v2023_v59 = vadd.f32 %v488_v57, %v417_v55 }
 0x15d   : > { %v492_v60 = vpop.f32.mrf.mxu0 }
 0x15e   : > { %v533_v61 = vmax.f32 %v2021_v58, %v2023_v59  ;;  %v2027_v63 = vadd.f32 %v492_v60, %v413_v54 }
 0x15f   : > { %v494_v62 = vpop.f32.mrf.mxu0 }
 0x160   : > { %v2029_v0 = vadd.f32 %v494_v62, %v417_v55  ;;  %534 = vmax.xlane.f32.xlu0 %v533_v61 }
 0x161   : > { %v498_v1 = vpop.f32.mrf.mxu0 }
 0x162   : > { %v536_v2 = vmax.f32 %v2027_v63, %v2029_v0  ;;  %v2033_v4 = vadd.f32 %v498_v1, %v413_v54 }
 0x163   : > { %v500_v3 = vpop.f32.mrf.mxu0 }
 0x164   : > { %v2035_v5 = vadd.f32 %v500_v3, %v417_v55  ;;  %537 = vmax.xlane.f32.xlu0 %v536_v2 }
 0x165   : > { %v504_v6 = vpop.f32.mrf.mxu0 }
 0x166   : > { %v539_v7 = vmax.f32 %v2033_v4, %v2035_v5  ;;  %v2039_v9 = vadd.f32 %v504_v6, %v413_v54 }
 0x167   : > { %v506_v8 = vpop.f32.mrf.mxu0 }
 0x168   : > { %v2041_v10 = vadd.f32 %v506_v8, %v417_v55  ;;  %540 = vmax.xlane.f32.xlu1 %v539_v7 }
 0x169   : > { %v510_v11 = vpop.f32.mrf.mxu0 }
 0x16a   : > { %v542_v12 = vmax.f32 %v2039_v9, %v2041_v10  ;;  %v2045_v14 = vadd.f32 %v510_v11, %v413_v54 }
 0x16b   : > { %v512_v13 = vpop.f32.mrf.mxu0 }
 0x16c   : > { %v2047_v15 = vadd.f32 %v512_v13, %v417_v55  ;;  %543 = vmax.xlane.f32.xlu1 %v542_v12 }
 0x16d   : > { %v516_v16 = vpop.f32.mrf.mxu0 }
 0x16e   : > { %v545_v17 = vmax.f32 %v2045_v14, %v2047_v15  ;;  %v2051_v19 = vadd.f32 %v516_v16, %v413_v54 }
 0x16f   : > { %v518_v18 = vpop.f32.mrf.mxu0 }
 0x170   : > { %v2053_v20 = vadd.f32 %v518_v18, %v417_v55  ;;  %546 = vmax.xlane.f32.xlu0 %v545_v17 }
 0x171   : > { %v522_v21 = vpop.f32.mrf.mxu0 }
 0x172   : > { %v548_v22 = vmax.f32 %v2051_v19, %v2053_v20  ;;  %v2057_v24 = vadd.f32 %v522_v21, %v413_v54 }
 0x173   : > { %v524_v23 = vpop.f32.mrf.mxu0 }
 0x174   : > { %v2059_v25 = vadd.f32 %v524_v23, %v417_v55  ;;  %549 = vmax.xlane.f32.xlu1 %v548_v22 }
 0x175   : > { %v528_v26 = vpop.f32.mrf.mxu0 }
 0x176   : > { %v551_v27 = vmax.f32 %v2057_v24, %v2059_v25  ;;  %v2063_v29 = vadd.f32 %v528_v26, %v413_v54 }
 0x177   : > { %v530_v28 = vpop.f32.mrf.mxu0 }
 0x178   : > { %v2065_v30 = vadd.f32 %v530_v28, %v417_v55  ;;  %552 = vmax.xlane.f32.xlu0 %v551_v27 }
 0x17a   : > { %v554_v31 = vmax.f32 %v2063_v29, %v2065_v30 }
 0x17c   : > { %555 = vmax.xlane.f32.xlu1 %v554_v31 }
 0x1e9   : > { %v535_v32 = vpop.xlane.xlu0 %534 }
 0x1ea   : > { %vm557_vm0 = vcmp.eq.f32.partialorder %v2021_v58, %v535_v32  ;;  %vm558_vm1 = vcmp.eq.f32.partialorder %v2023_v59, %v535_v32 }
 0x1eb   : > { %v573_v33 = vsel %vm557_vm0, -inf, %v2021_v58  ;;  %v574_v34 = vsel %vm558_vm1, -inf, %v2023_v59 }
 0x1ec   : > { %v589_v35 = vmax.f32 %v573_v33, %v574_v34 }
 0x1ed   : > { %v538_v36 = vpop.xlane.xlu0 %537 }
 0x1ee   : > { %vm559_vm2 = vcmp.eq.f32.partialorder %v2027_v63, %v538_v36  ;;  %vm560_vm3 = vcmp.eq.f32.partialorder %v2029_v0, %v538_v36  ;;  %590 = vmax.xlane.f32.xlu0 %v589_v35 }
 0x1ef   : > { %v575_v37 = vsel %vm559_vm2, -inf, %v2027_v63  ;;  %v576_v38 = vsel %vm560_vm3, -inf, %v2029_v0 }
 0x1f0   : > { %v592_v39 = vmax.f32 %v575_v37, %v576_v38 }
 0x1f1   : > { %v541_v40 = vpop.xlane.xlu1 %540 }
 0x1f2   : > { %vm561_vm4 = vcmp.eq.f32.partialorder %v2033_v4, %v541_v40  ;;  %vm562_vm5 = vcmp.eq.f32.partialorder %v2035_v5, %v541_v40  ;;  %593 = vmax.xlane.f32.xlu1 %v592_v39 }
 0x1f3   : > { %v577_v41 = vsel %vm561_vm4, -inf, %v2033_v4  ;;  %v578_v42 = vsel %vm562_vm5, -inf, %v2035_v5 }
 0x1f4   : > { %v595_v43 = vmax.f32 %v577_v41, %v578_v42 }
 0x1f5   : > { %v544_v44 = vpop.xlane.xlu1 %543 }
 0x1f6   : > { %vm563_vm6 = vcmp.eq.f32.partialorder %v2039_v9, %v544_v44  ;;  %vm564_vm7 = vcmp.eq.f32.partialorder %v2041_v10, %v544_v44  ;;  %596 = vmax.xlane.f32.xlu0 %v595_v43 }
 0x1f7   : > { %v579_v45 = vsel %vm563_vm6, -inf, %v2039_v9  ;;  %v580_v46 = vsel %vm564_vm7, -inf, %v2041_v10 }
 0x1f8   : > { %v598_v47 = vmax.f32 %v579_v45, %v580_v46 }
 0x1f9   : > { %v547_v48 = vpop.xlane.xlu0 %546 }
 0x1fa   : > { %vm565_vm8 = vcmp.eq.f32.partialorder %v2045_v14, %v547_v48  ;;  %vm566_vm9 = vcmp.eq.f32.partialorder %v2047_v15, %v547_v48  ;;  %599 = vmax.xlane.f32.xlu1 %v598_v47 }
 0x1fb   : > { %v581_v49 = vsel %vm565_vm8, -inf, %v2045_v14  ;;  %v582_v50 = vsel %vm566_vm9, -inf, %v2047_v15 }
 0x1fc   : > { %v601_v51 = vmax.f32 %v581_v49, %v582_v50 }
 0x1fd   : > { %v550_v52 = vpop.xlane.xlu1 %549 }
 0x1fe   : > { %vm567_vm10 = vcmp.eq.f32.partialorder %v2051_v19, %v550_v52  ;;  %vm568_vm11 = vcmp.eq.f32.partialorder %v2053_v20, %v550_v52  ;;  %602 = vmax.xlane.f32.xlu0 %v601_v51 }
 0x1ff   : > { %v583_v53 = vsel %vm567_vm10, -inf, %v2051_v19  ;;  %v584_v54 = vsel %vm568_vm11, -inf, %v2053_v20 }
 0x200   : > { %v604_v55 = vmax.f32 %v583_v53, %v584_v54 }
 0x201   : > { %v553_v56 = vpop.xlane.xlu0 %552 }
 0x202   : > { %vm569_vm12 = vcmp.eq.f32.partialorder %v2057_v24, %v553_v56  ;;  %vm570_vm13 = vcmp.eq.f32.partialorder %v2059_v25, %v553_v56  ;;  %605 = vmax.xlane.f32.xlu1 %v604_v55 }
 0x203   : > { %v585_v57 = vsel %vm569_vm12, -inf, %v2057_v24  ;;  %v586_v60 = vsel %vm570_vm13, -inf, %v2059_v25 }
 0x204   : > { %v607_v61 = vmax.f32 %v585_v57, %v586_v60 }
 0x205   : > { %v556_v62 = vpop.xlane.xlu1 %555 }
 0x206   : > { %vm571_vm14 = vcmp.eq.f32.partialorder %v2063_v29, %v556_v62  ;;  %vm572_vm15 = vcmp.eq.f32.partialorder %v2065_v30, %v556_v62  ;;  %608 = vmax.xlane.f32.xlu0 %v607_v61 }
 0x207   : > { %v587_v1 = vsel %vm571_vm14, -inf, %v2063_v29  ;;  %v588_v2 = vsel %vm572_vm15, -inf, %v2065_v30 }
 0x208   : > { %v610_v3 = vmax.f32 %v587_v1, %v588_v2 }
 0x20a   : > { %611 = vmax.xlane.f32.xlu1 %v610_v3 }
 0x277   : > { %v591_v6 = vpop.xlane.xlu0 %590 }
 0x278   : > { %vm613_vm0 = vcmp.eq.f32.partialorder %v573_v33, %v591_v6  ;;  %vm614_vm1 = vcmp.eq.f32.partialorder %v574_v34, %v591_v6 }
 0x279   : > { %v629_v7 = vsel %vm613_vm0, -inf, %v573_v33  ;;  %v630_v8 = vsel %vm614_vm1, -inf, %v574_v34 }
 0x27a   : > { %v645_v11 = vmax.f32 %v629_v7, %v630_v8 }
 0x27b   : > { %v594_v12 = vpop.xlane.xlu1 %593 }
 0x27c   : > { %vm615_vm2 = vcmp.eq.f32.partialorder %v575_v37, %v594_v12  ;;  %vm616_vm3 = vcmp.eq.f32.partialorder %v576_v38, %v594_v12  ;;  %646 = vmax.xlane.f32.xlu0 %v645_v11 }
 0x27d   : > { %v631_v13 = vsel %vm615_vm2, -inf, %v575_v37  ;;  %v632_v16 = vsel %vm616_vm3, -inf, %v576_v38 }
 0x27e   : > { %v648_v17 = vmax.f32 %v631_v13, %v632_v16 }
 0x27f   : > { %v597_v18 = vpop.xlane.xlu0 %596 }
 0x280   : > { %vm617_vm4 = vcmp.eq.f32.partialorder %v577_v41, %v597_v18  ;;  %vm618_vm5 = vcmp.eq.f32.partialorder %v578_v42, %v597_v18  ;;  %649 = vmax.xlane.f32.xlu1 %v648_v17 }
 0x281   : > { %v633_v21 = vsel %vm617_vm4, -inf, %v577_v41  ;;  %v634_v22 = vsel %vm618_vm5, -inf, %v578_v42 }
 0x282   : > { %v651_v23 = vmax.f32 %v633_v21, %v634_v22 }
 0x283   : > { %v600_v26 = vpop.xlane.xlu1 %599 }
 0x284   : > { %vm619_vm6 = vcmp.eq.f32.partialorder %v579_v45, %v600_v26  ;;  %vm620_vm7 = vcmp.eq.f32.partialorder %v580_v46, %v600_v26  ;;  %652 = vmax.xlane.f32.xlu0 %v651_v23 }
 0x285   : > { %v635_v27 = vsel %vm619_vm6, -inf, %v579_v45  ;;  %v636_v28 = vsel %vm620_vm7, -inf, %v580_v46 }
 0x286   : > { %v654_v31 = vmax.f32 %v635_v27, %v636_v28 }
 0x287   : > { %v603_v32 = vpop.xlane.xlu0 %602 }
 0x288   : > { %vm621_vm8 = vcmp.eq.f32.partialorder %v581_v49, %v603_v32  ;;  %vm622_vm9 = vcmp.eq.f32.partialorder %v582_v50, %v603_v32  ;;  %655 = vmax.xlane.f32.xlu1 %v654_v31 }
 0x289   : > { %v637_v33 = vsel %vm621_vm8, -inf, %v581_v49  ;;  %v638_v34 = vsel %vm622_vm9, -inf, %v582_v50 }
 0x28a   : > { %v657_v35 = vmax.f32 %v637_v33, %v638_v34 }
 0x28b   : > { %v606_v36 = vpop.xlane.xlu1 %605 }
 0x28c   : > { %vm623_vm10 = vcmp.eq.f32.partialorder %v583_v53, %v606_v36  ;;  %vm624_vm11 = vcmp.eq.f32.partialorder %v584_v54, %v606_v36  ;;  %658 = vmax.xlane.f32.xlu0 %v657_v35 }
 0x28d   : > { %v639_v37 = vsel %vm623_vm10, -inf, %v583_v53  ;;  %v640_v38 = vsel %vm624_vm11, -inf, %v584_v54 }
 0x28e   : > { %v660_v39 = vmax.f32 %v639_v37, %v640_v38 }
 0x28f   : > { %v609_v40 = vpop.xlane.xlu0 %608 }
 0x290   : > { %vm625_vm12 = vcmp.eq.f32.partialorder %v585_v57, %v609_v40  ;;  %vm626_vm13 = vcmp.eq.f32.partialorder %v586_v60, %v609_v40  ;;  %661 = vmax.xlane.f32.xlu1 %v660_v39 }
 0x291   : > { %v641_v41 = vsel %vm625_vm12, -inf, %v585_v57  ;;  %v642_v42 = vsel %vm626_vm13, -inf, %v586_v60 }
 0x292   : > { %v663_v43 = vmax.f32 %v641_v41, %v642_v42 }
 0x293   : > { %v612_v44 = vpop.xlane.xlu1 %611 }
 0x294   : > { %vm627_vm14 = vcmp.eq.f32.partialorder %v587_v1, %v612_v44  ;;  %vm628_vm15 = vcmp.eq.f32.partialorder %v588_v2, %v612_v44  ;;  %664 = vmax.xlane.f32.xlu0 %v663_v43 }
 0x295   : > { %v643_v45 = vsel %vm627_vm14, -inf, %v587_v1  ;;  %v644_v46 = vsel %vm628_vm15, -inf, %v588_v2 }
 0x296   : > { %v666_v47 = vmax.f32 %v643_v45, %v644_v46 }
 0x298   : > { %667 = vmax.xlane.f32.xlu1 %v666_v47 }
 0x305   : > { %v647_v48 = vpop.xlane.xlu0 %646 }
 0x306   : > { %vm669_vm0 = vcmp.eq.f32.partialorder %v629_v7, %v647_v48  ;;  %vm670_vm1 = vcmp.eq.f32.partialorder %v630_v8, %v647_v48 }
 0x307   : > { %v685_v49 = vsel %vm669_vm0, -inf, %v629_v7  ;;  %v686_v50 = vsel %vm670_vm1, -inf, %v630_v8 }
 0x308   : > { %v701_v51 = vmax.f32 %v685_v49, %v686_v50 }
 0x309   : > { %v650_v52 = vpop.xlane.xlu1 %649 }
 0x30a   : > { %vm671_vm2 = vcmp.eq.f32.partialorder %v631_v13, %v650_v52  ;;  %vm672_vm3 = vcmp.eq.f32.partialorder %v632_v16, %v650_v52  ;;  %702 = vmax.xlane.f32.xlu0 %v701_v51 }
 0x30b   : > { %v687_v53 = vsel %vm671_vm2, -inf, %v631_v13  ;;  %v688_v54 = vsel %vm672_vm3, -inf, %v632_v16 }
 0x30c   : > { %v704_v55 = vmax.f32 %v687_v53, %v688_v54 }
 0x30d   : > { %v653_v56 = vpop.xlane.xlu0 %652 }
 0x30e   : > { %vm673_vm4 = vcmp.eq.f32.partialorder %v633_v21, %v653_v56  ;;  %vm674_vm5 = vcmp.eq.f32.partialorder %v634_v22, %v653_v56  ;;  %705 = vmax.xlane.f32.xlu1 %v704_v55 }
 0x30f   : > { %v689_v57 = vsel %vm673_vm4, -inf, %v633_v21  ;;  %v690_v60 = vsel %vm674_vm5, -inf, %v634_v22 }
 0x310   : > { %v707_v61 = vmax.f32 %v689_v57, %v690_v60 }
 0x311   : > { %v656_v62 = vpop.xlane.xlu1 %655 }
 0x312   : > { %vm675_vm6 = vcmp.eq.f32.partialorder %v635_v27, %v656_v62  ;;  %vm676_vm7 = vcmp.eq.f32.partialorder %v636_v28, %v656_v62  ;;  %708 = vmax.xlane.f32.xlu0 %v707_v61 }
 0x313   : > { %v691_v1 = vsel %vm675_vm6, -inf, %v635_v27  ;;  %v692_v2 = vsel %vm676_vm7, -inf, %v636_v28 }
 0x314   : > { %v710_v3 = vmax.f32 %v691_v1, %v692_v2 }
 0x315   : > { %v659_v6 = vpop.xlane.xlu0 %658 }
 0x316   : > { %vm677_vm8 = vcmp.eq.f32.partialorder %v637_v33, %v659_v6  ;;  %vm678_vm9 = vcmp.eq.f32.partialorder %v638_v34, %v659_v6  ;;  %711 = vmax.xlane.f32.xlu1 %v710_v3 }
 0x317   : > { %v693_v7 = vsel %vm677_vm8, -inf, %v637_v33  ;;  %v694_v8 = vsel %vm678_vm9, -inf, %v638_v34 }
 0x318   : > { %v713_v11 = vmax.f32 %v693_v7, %v694_v8 }
 0x319   : > { %v662_v12 = vpop.xlane.xlu1 %661 }
 0x31a   : > { %vm679_vm10 = vcmp.eq.f32.partialorder %v639_v37, %v662_v12  ;;  %vm680_vm11 = vcmp.eq.f32.partialorder %v640_v38, %v662_v12  ;;  %714 = vmax.xlane.f32.xlu0 %v713_v11 }
 0x31b   : > { %v695_v13 = vsel %vm679_vm10, -inf, %v639_v37  ;;  %v696_v16 = vsel %vm680_vm11, -inf, %v640_v38 }
 0x31c   : > { %v716_v17 = vmax.f32 %v695_v13, %v696_v16 }
 0x31d   : > { %v665_v18 = vpop.xlane.xlu0 %664 }
 0x31e   : > { %vm681_vm12 = vcmp.eq.f32.partialorder %v641_v41, %v665_v18  ;;  %vm682_vm13 = vcmp.eq.f32.partialorder %v642_v42, %v665_v18  ;;  %717 = vmax.xlane.f32.xlu1 %v716_v17 }
 0x31f   : > { %v697_v21 = vsel %vm681_vm12, -inf, %v641_v41  ;;  %v698_v22 = vsel %vm682_vm13, -inf, %v642_v42 }
 0x320   : > { %v719_v23 = vmax.f32 %v697_v21, %v698_v22 }
 0x321   : > { %v668_v26 = vpop.xlane.xlu1 %667 }
 0x322   : > { %vm683_vm14 = vcmp.eq.f32.partialorder %v643_v45, %v668_v26  ;;  %vm684_vm15 = vcmp.eq.f32.partialorder %v644_v46, %v668_v26  ;;  %720 = vmax.xlane.f32.xlu0 %v719_v23 }
 0x323   : > { %v699_v27 = vsel %vm683_vm14, -inf, %v643_v45  ;;  %v700_v28 = vsel %vm684_vm15, -inf, %v644_v46 }
 0x324   : > { %v722_v31 = vmax.f32 %v699_v27, %v700_v28 }
 0x326   : > { %723 = vmax.xlane.f32.xlu1 %v722_v31 }
 0x393   : > { %v703_v32 = vpop.xlane.xlu0 %702 }
 0x394   : > { %vm725_vm0 = vcmp.eq.f32.partialorder %v685_v49, %v703_v32  ;;  %vm726_vm1 = vcmp.eq.f32.partialorder %v686_v50, %v703_v32 }
 0x395   : > { %v741_v33 = vsel %vm725_vm0, -inf, %v685_v49  ;;  %v742_v34 = vsel %vm726_vm1, -inf, %v686_v50 }
 0x396   : > { %v757_v35 = vmax.f32 %v741_v33, %v742_v34 }
 0x397   : > { %v706_v36 = vpop.xlane.xlu1 %705 }
 0x398   : > { %vm727_vm2 = vcmp.eq.f32.partialorder %v687_v53, %v706_v36  ;;  %vm728_vm3 = vcmp.eq.f32.partialorder %v688_v54, %v706_v36  ;;  %758 = vmax.xlane.f32.xlu0 %v757_v35 }
 0x399   : > { %v743_v37 = vsel %vm727_vm2, -inf, %v687_v53  ;;  %v744_v38 = vsel %vm728_vm3, -inf, %v688_v54 }
 0x39a   : > { %v760_v39 = vmax.f32 %v743_v37, %v744_v38 }
 0x39b   : > { %v709_v40 = vpop.xlane.xlu0 %708 }
 0x39c   : > { %vm729_vm4 = vcmp.eq.f32.partialorder %v689_v57, %v709_v40  ;;  %vm730_vm5 = vcmp.eq.f32.partialorder %v690_v60, %v709_v40  ;;  %761 = vmax.xlane.f32.xlu1 %v760_v39 }
 0x39d   : > { %v745_v41 = vsel %vm729_vm4, -inf, %v689_v57  ;;  %v746_v42 = vsel %vm730_vm5, -inf, %v690_v60 }
 0x39e   : > { %v763_v43 = vmax.f32 %v745_v41, %v746_v42 }
 0x39f   : > { %v712_v44 = vpop.xlane.xlu1 %711 }
 0x3a0   : > { %vm731_vm6 = vcmp.eq.f32.partialorder %v691_v1, %v712_v44  ;;  %vm732_vm7 = vcmp.eq.f32.partialorder %v692_v2, %v712_v44  ;;  %764 = vmax.xlane.f32.xlu0 %v763_v43 }
 0x3a1   : > { %v747_v45 = vsel %vm731_vm6, -inf, %v691_v1  ;;  %v748_v46 = vsel %vm732_vm7, -inf, %v692_v2 }
 0x3a2   : > { %v766_v47 = vmax.f32 %v747_v45, %v748_v46 }
 0x3a3   : > { %v715_v48 = vpop.xlane.xlu0 %714 }
 0x3a4   : > { %vm733_vm8 = vcmp.eq.f32.partialorder %v693_v7, %v715_v48  ;;  %vm734_vm9 = vcmp.eq.f32.partialorder %v694_v8, %v715_v48  ;;  %767 = vmax.xlane.f32.xlu1 %v766_v47 }
 0x3a5   : > { %v749_v49 = vsel %vm733_vm8, -inf, %v693_v7  ;;  %v750_v50 = vsel %vm734_vm9, -inf, %v694_v8 }
 0x3a6   : > { %v769_v51 = vmax.f32 %v749_v49, %v750_v50 }
 0x3a7   : > { %v718_v52 = vpop.xlane.xlu1 %717 }
 0x3a8   : > { %vm735_vm10 = vcmp.eq.f32.partialorder %v695_v13, %v718_v52  ;;  %vm736_vm11 = vcmp.eq.f32.partialorder %v696_v16, %v718_v52  ;;  %770 = vmax.xlane.f32.xlu0 %v769_v51 }
 0x3a9   : > { %v751_v53 = vsel %vm735_vm10, -inf, %v695_v13  ;;  %v752_v54 = vsel %vm736_vm11, -inf, %v696_v16 }
 0x3aa   : > { %v772_v55 = vmax.f32 %v751_v53, %v752_v54 }
 0x3ab   : > { %v721_v56 = vpop.xlane.xlu0 %720 }
 0x3ac   : > { %vm737_vm12 = vcmp.eq.f32.partialorder %v697_v21, %v721_v56  ;;  %vm738_vm13 = vcmp.eq.f32.partialorder %v698_v22, %v721_v56  ;;  %773 = vmax.xlane.f32.xlu1 %v772_v55 }
 0x3ad   : > { %v753_v57 = vsel %vm737_vm12, -inf, %v697_v21  ;;  %v754_v60 = vsel %vm738_vm13, -inf, %v698_v22 }
 0x3ae   : > { %v775_v61 = vmax.f32 %v753_v57, %v754_v60 }
 0x3af   : > { %v724_v62 = vpop.xlane.xlu1 %723 }
 0x3b0   : > { %vm739_vm14 = vcmp.eq.f32.partialorder %v699_v27, %v724_v62  ;;  %vm740_vm15 = vcmp.eq.f32.partialorder %v700_v28, %v724_v62  ;;  %776 = vmax.xlane.f32.xlu0 %v775_v61 }
 0x3b1   : > { %v755_v1 = vsel %vm739_vm14, -inf, %v699_v27  ;;  %v756_v2 = vsel %vm740_vm15, -inf, %v700_v28 }
 0x3b2   : > { %v778_v3 = vmax.f32 %v755_v1, %v756_v2 }
 0x3b4   : > { %779 = vmax.xlane.f32.xlu1 %v778_v3 }
 0x421   : > { %v759_v6 = vpop.xlane.xlu0 %758 }
 0x422   : > { %vm781_vm0 = vcmp.eq.f32.partialorder %v741_v33, %v759_v6  ;;  %vm782_vm1 = vcmp.eq.f32.partialorder %v742_v34, %v759_v6 }
 0x423   : > { %v797_v7 = vsel %vm781_vm0, -inf, %v741_v33  ;;  %v798_v8 = vsel %vm782_vm1, -inf, %v742_v34 }
 0x424   : > { %v813_v11 = vmax.f32 %v797_v7, %v798_v8 }
 0x425   : > { %v762_v12 = vpop.xlane.xlu1 %761 }
 0x426   : > { %vm783_vm2 = vcmp.eq.f32.partialorder %v743_v37, %v762_v12  ;;  %vm784_vm3 = vcmp.eq.f32.partialorder %v744_v38, %v762_v12  ;;  %814 = vmax.xlane.f32.xlu0 %v813_v11 }
 0x427   : > { %v799_v13 = vsel %vm783_vm2, -inf, %v743_v37  ;;  %v800_v16 = vsel %vm784_vm3, -inf, %v744_v38 }
 0x428   : > { %v816_v17 = vmax.f32 %v799_v13, %v800_v16 }
 0x429   : > { %v765_v18 = vpop.xlane.xlu0 %764 }
 0x42a   : > { %vm785_vm4 = vcmp.eq.f32.partialorder %v745_v41, %v765_v18  ;;  %vm786_vm5 = vcmp.eq.f32.partialorder %v746_v42, %v765_v18  ;;  %817 = vmax.xlane.f32.xlu1 %v816_v17 }
 0x42b   : > { %v801_v21 = vsel %vm785_vm4, -inf, %v745_v41  ;;  %v802_v22 = vsel %vm786_vm5, -inf, %v746_v42 }
 0x42c   : > { %v819_v23 = vmax.f32 %v801_v21, %v802_v22 }
 0x42d   : > { %v768_v26 = vpop.xlane.xlu1 %767 }
 0x42e   : > { %vm787_vm6 = vcmp.eq.f32.partialorder %v747_v45, %v768_v26  ;;  %vm788_vm7 = vcmp.eq.f32.partialorder %v748_v46, %v768_v26  ;;  %820 = vmax.xlane.f32.xlu0 %v819_v23 }
 0x42f   : > { %v803_v27 = vsel %vm787_vm6, -inf, %v747_v45  ;;  %v804_v28 = vsel %vm788_vm7, -inf, %v748_v46 }
 0x430   : > { %v822_v31 = vmax.f32 %v803_v27, %v804_v28 }
 0x431   : > { %v771_v32 = vpop.xlane.xlu0 %770 }
 0x432   : > { %vm789_vm8 = vcmp.eq.f32.partialorder %v749_v49, %v771_v32  ;;  %vm790_vm9 = vcmp.eq.f32.partialorder %v750_v50, %v771_v32  ;;  %823 = vmax.xlane.f32.xlu1 %v822_v31  ;;  %v1012_v32 = vld [vmem:[#allocation7 + $0xf8] sm:$0xff] }
 0x433   : > { %v805_v33 = vsel %vm789_vm8, -inf, %v749_v49  ;;  %v806_v34 = vsel %vm790_vm9, -inf, %v750_v50  ;;  %1471 = vmatprep.subr.mxu1 %v1012_v32 }
 0x434   : > { %v825_v35 = vmax.f32 %v805_v33, %v806_v34 }
 0x435   : > { %v774_v36 = vpop.xlane.xlu1 %773 }
 0x436   : > { %vm791_vm10 = vcmp.eq.f32.partialorder %v751_v53, %v774_v36  ;;  %vm792_vm11 = vcmp.eq.f32.partialorder %v752_v54, %v774_v36  ;;  %826 = vmax.xlane.f32.xlu0 %v825_v35  ;;  %v995_v35 = vld [vmem:[#allocation7 + $0x70] sm:$0xff]  ;;  %v1010_v36 = vld [vmem:[#allocation7 + $0xe8] sm:$0xff] }
 0x437   : > { %v807_v37 = vsel %vm791_vm10, -inf, %v751_v53  ;;  %v808_v38 = vsel %vm792_vm11, -inf, %v752_v54 }
 0x438   : > { %v828_v39 = vmax.f32 %v807_v37, %v808_v38 }
 0x439   : > { %v777_v40 = vpop.xlane.xlu0 %776 }
 0x43a   : > { %vm793_vm12 = vcmp.eq.f32.partialorder %v753_v57, %v777_v40  ;;  %vm794_vm13 = vcmp.eq.f32.partialorder %v754_v60, %v777_v40  ;;  %829 = vmax.xlane.f32.xlu1 %v828_v39  ;;  %v993_v39 = vld [vmem:[#allocation7 + $0x60] sm:$0xff]  ;;  %v1008_v40 = vld [vmem:[#allocation7 + $0xd8] sm:$0xff] }
 0x43b   : > { %v809_v41 = vsel %vm793_vm12, -inf, %v753_v57  ;;  %v810_v42 = vsel %vm794_vm13, -inf, %v754_v60 }
 0x43c   : > { %v831_v43 = vmax.f32 %v809_v41, %v810_v42 }
 0x43d   : > { %v780_v44 = vpop.xlane.xlu1 %779 }
 0x43e   : > { %vm795_vm14 = vcmp.eq.f32.partialorder %v755_v1, %v780_v44  ;;  %vm796_vm15 = vcmp.eq.f32.partialorder %v756_v2, %v780_v44  ;;  %832 = vmax.xlane.f32.xlu0 %v831_v43  ;;  %v991_v43 = vld [vmem:[#allocation7 + $0x50] sm:$0xff]  ;;  %v1006_v44 = vld [vmem:[#allocation7 + $0xc8] sm:$0xff] }
 0x43f   : > { %v811_v45 = vsel %vm795_vm14, -inf, %v755_v1  ;;  %v812_v46 = vsel %vm796_vm15, -inf, %v756_v2 }
 0x440   : > { %v834_v47 = vmax.f32 %v811_v45, %v812_v46 }
 0x442   : > { %835 = vmax.xlane.f32.xlu1 %v834_v47  ;;  %v989_v47 = vld [vmem:[#allocation7 + $0x40] sm:$0xff] }
 0x4af   : > { %v815_v48 = vpop.xlane.xlu0 %814 }
 0x4b0   : > { %vm837_vm0 = vcmp.eq.f32.partialorder %v797_v7, %v815_v48  ;;  %vm838_vm1 = vcmp.eq.f32.partialorder %v798_v8, %v815_v48  ;;  %v1004_v48 = vld [vmem:[#allocation7 + $0xb8] sm:$0xff] }
 0x4b1   : > { %v2101_v49 = vsel %vm837_vm0, -inf, %v797_v7  ;;  %v2103_v50 = vsel %vm838_vm1, -inf, %v798_v8 }
 0x4b2   : > { %v869_v51 = vmax.f32 %v2101_v49, %v2103_v50 }
 0x4b3   : > { %v818_v52 = vpop.xlane.xlu1 %817 }
 0x4b4   : > { %vm839_vm2 = vcmp.eq.f32.partialorder %v799_v13, %v818_v52  ;;  %vm840_vm3 = vcmp.eq.f32.partialorder %v800_v16, %v818_v52  ;;  %870 = vmax.xlane.f32.xlu0 %v869_v51  ;;  %v988_v51 = vld [vmem:[#allocation7 + $0x38] sm:$0xff]  ;;  %v1003_v52 = vld [vmem:[#allocation7 + $0xb0] sm:$0xff] }
 0x4b5   : > { %v2107_v53 = vsel %vm839_vm2, -inf, %v799_v13  ;;  %v2109_v54 = vsel %vm840_vm3, -inf, %v800_v16 }
 0x4b6   : > { %v872_v55 = vmax.f32 %v2107_v53, %v2109_v54 }
 0x4b7   : > { %v821_v56 = vpop.xlane.xlu0 %820 }
 0x4b8   : > { %vm841_vm4 = vcmp.eq.f32.partialorder %v801_v21, %v821_v56  ;;  %vm842_vm5 = vcmp.eq.f32.partialorder %v802_v22, %v821_v56  ;;  %873 = vmax.xlane.f32.xlu1 %v872_v55  ;;  %v987_v55 = vld [vmem:[#allocation7 + $0x30] sm:$0xff]  ;;  %v1002_v56 = vld [vmem:[#allocation7 + $0xa8] sm:$0xff] }
 0x4b9   : > { %v2113_v57 = vsel %vm841_vm4, -inf, %v801_v21  ;;  %v2115_v60 = vsel %vm842_vm5, -inf, %v802_v22 }
 0x4ba   : > { %v875_v61 = vmax.f32 %v2113_v57, %v2115_v60 }
 0x4bb   : > { %v824_v62 = vpop.xlane.xlu1 %823 }
 0x4bc   : > { %vm843_vm6 = vcmp.eq.f32.partialorder %v803_v27, %v824_v62  ;;  %vm844_vm7 = vcmp.eq.f32.partialorder %v804_v28, %v824_v62  ;;  %876 = vmax.xlane.f32.xlu0 %v875_v61  ;;  %v986_v61 = vld [vmem:[#allocation7 + $0x28] sm:$0xff]  ;;  %v1001_v62 = vld [vmem:[#allocation7 + $0xa0] sm:$0xff] }
 0x4bd   : > { %v2119_v1 = vsel %vm843_vm6, -inf, %v803_v27  ;;  %v2121_v2 = vsel %vm844_vm7, -inf, %v804_v28 }
 0x4be   : > { %v878_v3 = vmax.f32 %v2119_v1, %v2121_v2 }
 0x4bf   : > { %v827_v6 = vpop.xlane.xlu0 %826 }
 0x4c0   : > { %vm845_vm8 = vcmp.eq.f32.partialorder %v805_v33, %v827_v6  ;;  %vm846_vm9 = vcmp.eq.f32.partialorder %v806_v34, %v827_v6  ;;  %879 = vmax.xlane.f32.xlu1 %v878_v3  ;;  %v985_v3 = vld [vmem:[#allocation7 + $0x20] sm:$0xff]  ;;  %v1000_v6 = vld [vmem:[#allocation7 + $0x98] sm:$0xff] }
 0x4c1   : > { %v2125_v7 = vsel %vm845_vm8, -inf, %v805_v33  ;;  %v2127_v8 = vsel %vm846_vm9, -inf, %v806_v34  ;;  %v996_v33 = vld [vmem:[#allocation7 + $0x78] sm:$0xff]  ;;  %v1011_v34 = vld [vmem:[#allocation7 + $0xf0] sm:$0xff] }
 0x4c2   : > { %v881_v11 = vmax.f32 %v2125_v7, %v2127_v8  ;;  %1472 = vmatpush3.msra.mxu1 %v996_v33 }
 0x4c3   : > { %v830_v12 = vpop.xlane.xlu1 %829  ;;  %1473 = vmatprep.subr.mxu1 %v1011_v34 }
 0x4c4   : > { %vm847_vm10 = vcmp.eq.f32.partialorder %v807_v37, %v830_v12  ;;  %vm848_vm11 = vcmp.eq.f32.partialorder %v808_v38, %v830_v12  ;;  %882 = vmax.xlane.f32.xlu0 %v881_v11  ;;  %1474 = vmatpush3.msra.mxu1 %v995_v35  ;;  %v984_v11 = vld [vmem:[#allocation7 + $0x18] sm:$0xff]  ;;  %v999_v12 = vld [vmem:[#allocation7 + $0x90] sm:$0xff] }
 0x4c5   : > { %v2131_v13 = vsel %vm847_vm10, -inf, %v807_v37  ;;  %v2133_v16 = vsel %vm848_vm11, -inf, %v808_v38  ;;  %v994_v37 = vld [vmem:[#allocation7 + $0x68] sm:$0xff]  ;;  %v1009_v38 = vld [vmem:[#allocation7 + $0xe0] sm:$0xff]  ;;  %1475 = vmatprep.subr.mxu1 %v1010_v36 }
 0x4c6   : > { %v884_v17 = vmax.f32 %v2131_v13, %v2133_v16  ;;  %1476 = vmatpush3.msra.mxu1 %v994_v37 }
 0x4c7   : > { %v833_v18 = vpop.xlane.xlu0 %832  ;;  %1477 = vmatprep.subr.mxu1 %v1009_v38 }
 0x4c8   : > { %vm849_vm12 = vcmp.eq.f32.partialorder %v809_v41, %v833_v18  ;;  %vm850_vm13 = vcmp.eq.f32.partialorder %v810_v42, %v833_v18  ;;  %885 = vmax.xlane.f32.xlu1 %v884_v17  ;;  %1478 = vmatpush3.msra.mxu1 %v993_v39  ;;  %v983_v17 = vld [vmem:[#allocation7 + $0x10] sm:$0xff]  ;;  %v998_v18 = vld [vmem:[#allocation7 + $0x88] sm:$0xff] }
 0x4c9   : > { %v2137_v21 = vsel %vm849_vm12, -inf, %v809_v41  ;;  %v2139_v22 = vsel %vm850_vm13, -inf, %v810_v42  ;;  %v992_v41 = vld [vmem:[#allocation7 + $0x58] sm:$0xff]  ;;  %v1007_v42 = vld [vmem:[#allocation7 + $0xd0] sm:$0xff]  ;;  %1479 = vmatprep.subr.mxu1 %v1008_v40 }
 0x4ca   : > { %v887_v23 = vmax.f32 %v2137_v21, %v2139_v22  ;;  %1480 = vmatpush3.msra.mxu1 %v992_v41  ;;  %v997_v41 = vld [vmem:[#allocation7 + $0x80] sm:$0xff] }
 0x4cb   : > { %v836_v26 = vpop.xlane.xlu1 %835  ;;  %1481 = vmatprep.subr.mxu1 %v1007_v42 }
 0x4cc   : > { %vm851_vm14 = vcmp.eq.f32.partialorder %v811_v45, %v836_v26  ;;  %vm852_vm15 = vcmp.eq.f32.partialorder %v812_v46, %v836_v26  ;;  %888 = vmax.xlane.f32.xlu0 %v887_v23  ;;  %1482 = vmatpush3.msra.mxu1 %v991_v43  ;;  %v982_v23 = vld [vmem:[#allocation7 + $0x8] sm:$0xff]  ;;  %v981_v43 = vld [vmem:[#allocation7] sm:$0xff] }
 0x4cd   : > { %v2143_v27 = vsel %vm851_vm14, -inf, %v811_v45  ;;  %v2145_v28 = vsel %vm852_vm15, -inf, %v812_v46  ;;  %v990_v45 = vld [vmem:[#allocation7 + $0x48] sm:$0xff]  ;;  %v1005_v46 = vld [vmem:[#allocation7 + $0xc0] sm:$0xff]  ;;  %1483 = vmatprep.subr.mxu1 %v1006_v44 }
 0x4ce   : > { %v890_v31 = vmax.f32 %v2143_v27, %v2145_v28  ;;  %1484 = vmatpush3.msra.mxu1 %v990_v45 }
 0x4cf   : > { %1485 = vmatprep.subr.mxu1 %v1005_v46 }
 0x4d0   : > { %891 = vmax.xlane.f32.xlu1 %v890_v31  ;;  %1486 = vmatpush3.msra.mxu1 %v989_v47 }
 0x4d1   : > { %1487 = vmatprep.subr.mxu1 %v1004_v48 }
 0x4d2   : > { %1488 = vmatpush3.msra.mxu1 %v988_v51 }
 0x4d3   : > { %1489 = vmatprep.subr.mxu1 %v1003_v52 }
 0x4d4   : > { %1490 = vmatpush3.msra.mxu1 %v987_v55 }
 0x4d5   : > { %1491 = vmatprep.subr.mxu1 %v1002_v56 }
 0x4d6   : > { %1492 = vmatpush3.msra.mxu1 %v986_v61 }
 0x4d7   : > { %1493 = vmatprep.subr.mxu1 %v1001_v62 }
 0x4d8   : > { %1494 = vmatpush3.msra.mxu1 %v985_v3 }
 0x4d9   : > { %1495 = vmatprep.subr.mxu1 %v1000_v6 }
 0x4da   : > { %1496 = vmatpush3.msra.mxu1 %v984_v11 }
 0x4db   : > { %1497 = vmatprep.subr.mxu1 %v999_v12 }
 0x4dc   : > { %1498 = vmatpush3.msra.mxu1 %v983_v17 }
 0x4dd   : > { %1499 = vmatprep.subr.mxu1 %v998_v18 }
 0x4de   : > { %1500 = vmatpush3.msra.mxu1 %v982_v23 }
 0x4df   : > { %1501 = vmatprep.subr.mxu1 %v997_v41 }
 0x4e0   : > { %1502 = vmatpush3.msra.mxu1 %v981_v43 }
 0x53d   : > { %v871_v26 = vpop.xlane.xlu0 %870 }
 0x53e   : > { %vm893_vm0 = vcmp.eq.f32.partialorder %v2101_v49, %v871_v26  ;;  %vm894_vm1 = vcmp.eq.f32.partialorder %v2103_v50, %v871_v26  ;;  %v1605_v26 = vld [vmem:[%s2371_s4] ss:$0 sm:$0xff] }
 0x53f   : > { %v909_v31 = vsel %vm893_vm0, -inf, %v2101_v49  ;;  %v910_v32 = vsel %vm894_vm1, -inf, %v2103_v50 }
 0x540   : > { %v925_v33 = vmax.f32 %v909_v31, %v910_v32 }
 0x541   : > { %v874_v34 = vpop.xlane.xlu1 %873 }
 0x542   : > { %vm895_vm2 = vcmp.eq.f32.partialorder %v2107_v53, %v874_v34  ;;  %vm896_vm3 = vcmp.eq.f32.partialorder %v2109_v54, %v874_v34  ;;  %926 = vmax.xlane.f32.xlu0 %v925_v33 }
 0x543   : > { %v911_v35 = vsel %vm895_vm2, -inf, %v2107_v53  ;;  %v912_v36 = vsel %vm896_vm3, -inf, %v2109_v54 }
 0x544   : > { %v928_v37 = vmax.f32 %v911_v35, %v912_v36 }
 0x545   : > { %v877_v38 = vpop.xlane.xlu0 %876 }
 0x546   : > { %vm897_vm4 = vcmp.eq.f32.partialorder %v2113_v57, %v877_v38  ;;  %vm898_vm5 = vcmp.eq.f32.partialorder %v2115_v60, %v877_v38  ;;  %929 = vmax.xlane.f32.xlu1 %v928_v37 }
 0x547   : > { %v913_v49 = vsel %vm897_vm4, -inf, %v2113_v57  ;;  %v914_v50 = vsel %vm898_vm5, -inf, %v2115_v60 }
 0x548   : > { %v931_v39 = vmax.f32 %v913_v49, %v914_v50  ;;  %v1607_v49 = vld [vmem:[%s1987_s10 + $0x8] sm:$0xff] }
 0x549   : > { %v880_v40 = vpop.xlane.xlu1 %879 }
 0x54a   : > { %vm899_vm6 = vcmp.eq.f32.partialorder %v2119_v1, %v880_v40  ;;  %vm900_vm7 = vcmp.eq.f32.partialorder %v2121_v2, %v880_v40  ;;  %932 = vmax.xlane.f32.xlu0 %v931_v39 }
 0x54b   : > { %v915_v53 = vsel %vm899_vm6, -inf, %v2119_v1  ;;  %v916_v54 = vsel %vm900_vm7, -inf, %v2121_v2 }
 0x54c   : > { %v934_v42 = vmax.f32 %v915_v53, %v916_v54 }
 0x54d   : > { %v883_v44 = vpop.xlane.xlu0 %882 }
 0x54e   : > { %vm901_vm8 = vcmp.eq.f32.partialorder %v2125_v7, %v883_v44  ;;  %vm902_vm9 = vcmp.eq.f32.partialorder %v2127_v8, %v883_v44  ;;  %935 = vmax.xlane.f32.xlu1 %v934_v42  ;;  %v1608_v42 = vld [vmem:[%s1987_s10 + $0x10] sm:$0xff] }
 0x54f   : > { %v917_v57 = vsel %vm901_vm8, -inf, %v2125_v7  ;;  %v918_v60 = vsel %vm902_vm9, -inf, %v2127_v8 }
 0x550   : > { %v937_v45 = vmax.f32 %v917_v57, %v918_v60 }
 0x551   : > { %v886_v46 = vpop.xlane.xlu1 %885 }
 0x552   : > { %vm903_vm10 = vcmp.eq.f32.partialorder %v2131_v13, %v886_v46  ;;  %vm904_vm11 = vcmp.eq.f32.partialorder %v2133_v16, %v886_v46  ;;  %938 = vmax.xlane.f32.xlu0 %v937_v45 }
 0x553   : > { %v919_v1 = vsel %vm903_vm10, -inf, %v2131_v13  ;;  %v920_v2 = vsel %vm904_vm11, -inf, %v2133_v16 }
 0x554   : > { %v940_v47 = vmax.f32 %v919_v1, %v920_v2  ;;  %v1609_v1 = vld [vmem:[%s1987_s10 + $0x18] sm:$0xff] }
 0x555   : > { %v889_v48 = vpop.xlane.xlu0 %888 }
 0x556   : > { %vm905_vm12 = vcmp.eq.f32.partialorder %v2137_v21, %v889_v48  ;;  %vm906_vm13 = vcmp.eq.f32.partialorder %v2139_v22, %v889_v48  ;;  %941 = vmax.xlane.f32.xlu1 %v940_v47 }
 0x557   : > { %v921_v7 = vsel %vm905_vm12, -inf, %v2137_v21  ;;  %v922_v8 = vsel %vm906_vm13, -inf, %v2139_v22 }
 0x558   : > { %v943_v51 = vmax.f32 %v921_v7, %v922_v8 }
 0x559   : > { %v892_v52 = vpop.xlane.xlu1 %891 }
 0x55a   : > { %vm907_vm14 = vcmp.eq.f32.partialorder %v2143_v27, %v892_v52  ;;  %vm908_vm15 = vcmp.eq.f32.partialorder %v2145_v28, %v892_v52  ;;  %944 = vmax.xlane.f32.xlu0 %v943_v51  ;;  %v1610_v52 = vld [vmem:[%s1987_s10 + $0x20] sm:$0xff] }
 0x55b   : > { %v923_v13 = vsel %vm907_vm14, -inf, %v2143_v27  ;;  %v924_v16 = vsel %vm908_vm15, -inf, %v2145_v28 }
 0x55c   : > { %v946_v55 = vmax.f32 %v923_v13, %v924_v16 }
 0x55e   : > { %947 = vmax.xlane.f32.xlu1 %v946_v55 }
 0x5cb   : > { %v927_v56 = vpop.xlane.xlu0 %926 }
 0x5cc   : > { %vm949_vm0 = vcmp.ge.f32.partialorder %v2021_v58, %v927_v56  ;;  %vm950_vm1 = vcmp.ge.f32.partialorder %v2023_v59, %v927_v56 }
 0x5cd   : > { %v965_v21 = vsel %vm949_vm0, %v2021_v58, 0.0  ;;  %v966_v22 = vsel %vm950_vm1, %v2023_v59, 0.0  ;;  %1394 = vmatprep.mubr.msk.f32.mxu1 %vm950_vm1, %v2023_v59 }
 0x5ce   : > { %1167 = vst [vmem:[%s2187_s19] sm:$0xff] %v965_v21  ;;  %1168 = vst [vmem:[%s2187_s19 + $0x8] sm:$0xff] %v966_v22  ;;  %1395 = vmatmul.mubr.msk.f32.vlgmr.msra.gmra.mxu1 %vm949_vm0, %v2021_v58 }
 0x5cf   : > { %v930_v27 = vpop.xlane.xlu1 %929 }
 0x5d0   : > { %vm951_vm2 = vcmp.ge.f32.partialorder %v2027_v63, %v930_v27  ;;  %vm952_vm3 = vcmp.ge.f32.partialorder %v2029_v0, %v930_v27  ;;  %v1611_v27 = vld [vmem:[%s1987_s10 + $0x28] sm:$0xff] }
 0x5d1   : > { %v967_v28 = vsel %vm951_vm2, %v2027_v63, 0.0  ;;  %v968_v59 = vsel %vm952_vm3, %v2029_v0, 0.0  ;;  %1396 = vmatprep.mubr.msk.f32.mxu1 %vm952_vm3, %v2029_v0 }
 0x5d2   : > { %1169 = vst [vmem:[%s2187_s19 + $0x10] sm:$0xff] %v967_v28  ;;  %1170 = vst [vmem:[%s2187_s19 + $0x18] sm:$0xff] %v968_v59  ;;  %1397 = vmatmul.mubr.msk.f32.gmra.mxu1 %vm951_vm2, %v2027_v63 }
 0x5d3   : > { %v933_v61 = vpop.xlane.xlu0 %932 }
 0x5d4   : > { %vm953_vm4 = vcmp.ge.f32.partialorder %v2033_v4, %v933_v61  ;;  %vm954_vm5 = vcmp.ge.f32.partialorder %v2035_v5, %v933_v61 }
 0x5d5   : > { %v969_v58 = vsel %vm953_vm4, %v2033_v4, 0.0  ;;  %v970_v62 = vsel %vm954_vm5, %v2035_v5, 0.0  ;;  %1398 = vmatprep.mubr.msk.f32.mxu1 %vm954_vm5, %v2035_v5 }
 0x5d6   : > { %1171 = vst [vmem:[%s2187_s19 + $0x20] sm:$0xff] %v969_v58  ;;  %1172 = vst [vmem:[%s2187_s19 + $0x28] sm:$0xff] %v970_v62  ;;  %1399 = vmatmul.mubr.msk.f32.gmra.mxu1 %vm953_vm4, %v2033_v4 }
 0x5d7   : > { %v936_v0 = vpop.xlane.xlu1 %935 }
 0x5d8   : > { %vm955_vm6 = vcmp.ge.f32.partialorder %v2039_v9, %v936_v0  ;;  %vm956_vm7 = vcmp.ge.f32.partialorder %v2041_v10, %v936_v0 }
 0x5d9   : > { %v971_v63 = vsel %vm955_vm6, %v2039_v9, 0.0  ;;  %v972_v3 = vsel %vm956_vm7, %v2041_v10, 0.0  ;;  %1400 = vmatprep.mubr.msk.f32.mxu1 %vm956_vm7, %v2041_v10 }
 0x5da   : > { %1173 = vst [vmem:[%s2187_s19 + $0x30] sm:$0xff] %v971_v63  ;;  %1174 = vst [vmem:[%s2187_s19 + $0x38] sm:$0xff] %v972_v3  ;;  %1401 = vmatmul.mubr.msk.f32.gmra.mxu1 %vm955_vm6, %v2039_v9  ;;  %v1612_v63 = vld [vmem:[%s1987_s10 + $0x30] sm:$0xff] }
 0x5db   : > { %v939_v5 = vpop.xlane.xlu0 %938 }
 0x5dc   : > { %vm957_vm8 = vcmp.ge.f32.partialorder %v2045_v14, %v939_v5  ;;  %vm958_vm9 = vcmp.ge.f32.partialorder %v2047_v15, %v939_v5 }
 0x5dd   : > { %v973_v4 = vsel %vm957_vm8, %v2045_v14, 0.0  ;;  %v974_v6 = vsel %vm958_vm9, %v2047_v15, 0.0  ;;  %1402 = vmatprep.mubr.msk.f32.mxu1 %vm958_vm9, %v2047_v15 }
 0x5de   : > { %1175 = vst [vmem:[%s2187_s19 + $0x40] sm:$0xff] %v973_v4  ;;  %1176 = vst [vmem:[%s2187_s19 + $0x48] sm:$0xff] %v974_v6  ;;  %1403 = vmatmul.mubr.msk.f32.gmra.mxu1 %vm957_vm8, %v2045_v14  ;;  %v1613_v6 = vld [vmem:[%s1987_s10 + $0x38] sm:$0xff] }
 0x5df   : > { %v942_v10 = vpop.xlane.xlu1 %941 }
 0x5e0   : > { %vm959_vm10 = vcmp.ge.f32.partialorder %v2051_v19, %v942_v10  ;;  %vm960_vm11 = vcmp.ge.f32.partialorder %v2053_v20, %v942_v10 }
 0x5e1   : > { %v975_v9 = vsel %vm959_vm10, %v2051_v19, 0.0  ;;  %v976_v11 = vsel %vm960_vm11, %v2053_v20, 0.0  ;;  %1404 = vmatprep.mubr.msk.f32.mxu1 %vm960_vm11, %v2053_v20 }
 0x5e2   : > { %1177 = vst [vmem:[%s2187_s19 + $0x50] sm:$0xff] %v975_v9  ;;  %1178 = vst [vmem:[%s2187_s19 + $0x58] sm:$0xff] %v976_v11  ;;  %1405 = vmatmul.mubr.msk.f32.gmra.mxu1 %vm959_vm10, %v2051_v19 }
 0x5e3   : > { %v945_v15 = vpop.xlane.xlu0 %944 }
 0x5e4   : > { %vm961_vm12 = vcmp.ge.f32.partialorder %v2057_v24, %v945_v15  ;;  %vm962_vm13 = vcmp.ge.f32.partialorder %v2059_v25, %v945_v15 }
 0x5e5   : > { %v977_v14 = vsel %vm961_vm12, %v2057_v24, 0.0  ;;  %v978_v12 = vsel %vm962_vm13, %v2059_v25, 0.0  ;;  %1406 = vmatprep.mubr.msk.f32.mxu1 %vm962_vm13, %v2059_v25 }
 0x5e6   : > { %1179 = vst [vmem:[%s2187_s19 + $0x60] sm:$0xff] %v977_v14  ;;  %1180 = vst [vmem:[%s2187_s19 + $0x68] sm:$0xff] %v978_v12  ;;  %1407 = vmatmul.mubr.msk.f32.gmra.mxu1 %vm961_vm12, %v2057_v24 }
 0x5e7   : > { %v948_v20 = vpop.xlane.xlu1 %947 }
 0x5e8   : > { %vm963_vm14 = vcmp.ge.f32.partialorder %v2063_v29, %v948_v20  ;;  %vm964_vm15 = vcmp.ge.f32.partialorder %v2065_v30, %v948_v20 }
 0x5e9   : > { %v979_v19 = vsel %vm963_vm14, %v2063_v29, 0.0  ;;  %v980_v17 = vsel %vm964_vm15, %v2065_v30, 0.0  ;;  %1408 = vmatprep.mubr.msk.f32.mxu1 %vm964_vm15, %v2065_v30 }
 0x5ea   : > { %1181 = vst [vmem:[%s2187_s19 + $0x70] sm:$0xff] %v979_v19  ;;  %1182 = vst [vmem:[%s2187_s19 + $0x78] sm:$0xff] %v980_v17  ;;  %1409 = vmatmul.mubr.msk.f32.gmra.mxu1 %vm963_vm14, %v2063_v29  ;;  %v1606_v29 = vld [vmem:[%s1987_s10] sm:$0xff]  ;;  %s1799_s10 = smov [#allocation8]  }
 0x5eb   : > { %s1698_s29 = sshll.u32 %s1799_s10, 4  ;;  %s1699_s29 = int_to_ptr.vmem [resolvable:$false] %s1698_s29 }
 0x5ec   : > { %s1700_s21 = scalar_lea.vmem %s1699_s29, 2048  ;;  %p1701_p13 = scmp.lt.s32.totalorder %s2272_s16, %s1699_s29 }
 0x5ed   : > { %p1702_p0 = scmp.lt.s32.totalorder %s1700_s21, %s1694_s22 }
 0x5ef   : > { %p1703_p10 = por %p1702_p0, %p1701_p13 }
 0x5f1   : > { %p1704_p3 = pnand %p1703_p10, %p1697_p12 }
 0x68e   : > { %v1503_v25 = vpop.f32.mrf.mxu1 }
 0x690   : > { %v1504_v18 = vpop.f32.mrf.mxu1 }
 0x691   : > { %v1505_v24 = vadd.f32 %v1504_v18, %v1503_v25 }
 0x692   : > { %v1506_v23 = vpop.f32.mrf.mxu1 }
 0x693   : > { %v1080_v31 = vadd.f32 %v1605_v26, %v1505_v24 }
 0x694   : > { %v1507_v32 = vpop.f32.mrf.mxu1 }
 0x695   : > { %1159 = vst [vmem:[%s2253_s14] sm:$0xff] %v1080_v31  ;;  %v1508_v30 = vadd.f32 %v1507_v32, %v1506_v23  ;;  %v1118_v33 = vsub.f32 %v1080_v31, %v1606_v29 }
 0x696   : > { %v1509_v34 = vpop.f32.mrf.mxu1 }
 0x697   : > { %v1085_v35 = vadd.f32 %v1605_v26, %v1508_v30  ;;  %v1126_v36 = vmul.f32 %v1118_v33, %v1118_v33 }
 0x698   : > { %v1510_v37 = vpop.f32.mrf.mxu1 }
 0x699   : > { %1160 = vst [vmem:[%s2253_s14 + $0x8] sm:$0xff] %v1085_v35  ;;  %v1511_v38 = vadd.f32 %v1510_v37, %v1509_v34  ;;  %1134 = vadd.xlane.f32.xlu0 %v1126_v36  ;;  %v1119_v50 = vsub.f32 %v1085_v35, %v1607_v49 }
 0x69a   : > { %v1512_v39 = vpop.f32.mrf.mxu1 }
 0x69b   : > { %v1090_v40 = vadd.f32 %v1605_v26, %v1511_v38  ;;  %v1127_v53 = vmul.f32 %v1119_v50, %v1119_v50 }
 0x69c   : > { %v1513_v54 = vpop.f32.mrf.mxu1 }
 0x69d   : > { %1161 = vst [vmem:[%s2253_s14 + $0x10] sm:$0xff] %v1090_v40  ;;  %v1514_v41 = vadd.f32 %v1513_v54, %v1512_v39  ;;  %1136 = vadd.xlane.f32.xlu1 %v1127_v53  ;;  %v1120_v43 = vsub.f32 %v1090_v40, %v1608_v42 }
 0x69e   : > { %v1515_v44 = vpop.f32.mrf.mxu1 }
 0x69f   : > { %v1095_v57 = vadd.f32 %v1605_v26, %v1514_v41  ;;  %v1128_v60 = vmul.f32 %v1120_v43, %v1120_v43 }
 0x6a0   : > { %v1516_v45 = vpop.f32.mrf.mxu1 }
 0x6a1   : > { %1162 = vst [vmem:[%s2253_s14 + $0x18] sm:$0xff] %v1095_v57  ;;  %v1517_v46 = vadd.f32 %v1516_v45, %v1515_v44  ;;  %1138 = vadd.xlane.f32.xlu0 %v1128_v60  ;;  %v1121_v2 = vsub.f32 %v1095_v57, %v1609_v1 }
 0x6a2   : > { %v1518_v47 = vpop.f32.mrf.mxu1 }
 0x6a3   : > { %v1100_v48 = vadd.f32 %v1605_v26, %v1517_v46  ;;  %v1129_v7 = vmul.f32 %v1121_v2, %v1121_v2 }
 0x6a4   : > { %v1519_v8 = vpop.f32.mrf.mxu1 }
 0x6a5   : > { %1163 = vst [vmem:[%s2253_s14 + $0x20] sm:$0xff] %v1100_v48  ;;  %v1520_v51 = vadd.f32 %v1519_v8, %v1518_v47  ;;  %1140 = vadd.xlane.f32.xlu1 %v1129_v7  ;;  %v1122_v13 = vsub.f32 %v1100_v48, %v1610_v52 }
 0x6a6   : > { %v1521_v16 = vpop.f32.mrf.mxu1 }
 0x6a7   : > { %v1105_v55 = vadd.f32 %v1605_v26, %v1520_v51  ;;  %v1130_v56 = vmul.f32 %v1122_v13, %v1122_v13 }
 0x6a8   : > { %v1522_v21 = vpop.f32.mrf.mxu1 }
 0x6a9   : > { %1164 = vst [vmem:[%s2253_s14 + $0x28] sm:$0xff] %v1105_v55  ;;  %v1523_v22 = vadd.f32 %v1522_v21, %v1521_v16  ;;  %1142 = vadd.xlane.f32.xlu0 %v1130_v56  ;;  %v1123_v28 = vsub.f32 %v1105_v55, %v1611_v27 }
 0x6aa   : > { %v1524_v59 = vpop.f32.mrf.mxu1 }
 0x6ab   : > { %v1110_v61 = vadd.f32 %v1605_v26, %v1523_v22  ;;  %v1131_v58 = vmul.f32 %v1123_v28, %v1123_v28 }
 0x6ac   : > { %v1525_v62 = vpop.f32.mrf.mxu1 }
 0x6ad   : > { %1165 = vst [vmem:[%s2253_s14 + $0x30] sm:$0xff] %v1110_v61  ;;  %v1526_v0 = vadd.f32 %v1525_v62, %v1524_v59  ;;  %1144 = vadd.xlane.f32.xlu1 %v1131_v58  ;;  %v1124_v3 = vsub.f32 %v1110_v61, %v1612_v63 }
 0x6af   : > { %v1115_v5 = vadd.f32 %v1605_v26, %v1526_v0  ;;  %v1132_v4 = vmul.f32 %v1124_v3, %v1124_v3 }
 0x6b1   : > { %1166 = vst [vmem:[%s2253_s14 + $0x38] sm:$0xff] %v1115_v5  ;;  %1146 = vadd.xlane.f32.xlu0 %v1132_v4  ;;  %v1125_v10 = vsub.f32 %v1115_v5, %v1613_v6 }
 0x6b3   : > { %v1133_v9 = vmul.f32 %v1125_v10, %v1125_v10 }
 0x6b5   : > { %1148 = vadd.xlane.f32.xlu1 %v1133_v9 }
 0x6b6   : > { %1707 = shalt.err (!%p1704_p3)
}
 0x6b7   : > { %s1708_s13 = scalar_lea.hbm %s2279_s9, 1024  ;;  %s1712_s15 = scalar_lea.hbm %s2373_s6, 2048 }
 0x6b8   : > { %p1709_p11 = scmp.ne.s32.totalorder %s2279_s9, %s1708_s13  ;;  %p1713_p4 = scmp.lt.s32.totalorder %s2279_s9, %s2373_s6 }
 0x6b9   : > { %p1714_p6 = scmp.lt.s32.totalorder %s1712_s15, %s1708_s13 }
 0x6ba   : > { %p1710_p9 = pnand %p1709_p11, %p2395_p2 }
 0x6bb   : > { %p1715_p8 = por %p1714_p6, %p1713_p4 }
 0x6bc   : > { %p1711_p1 = pneg %p1710_p9 }
 0x6be   : > { %p1716_p5 = pnand %p1715_p8, %p1711_p1 }
 0x6c0   : > { %1719 = shalt.err (!%p1716_p5)
}
 0x6c1   : > { %s1800_s22 = smov 128   ;;  %s1801_s29 = smov 8  }
 0x6c2   : > { %1537 = dma.vmem_to_hbm [thread:$0]  (%p2395_p2), %s2272_s16, 1024, %s2279_s9, %s1189_s20, %s1800_s22, %s1800_s22, %s1801_s29  }
 0x6c3   : > { %s2309_s13 = scalar_lea.hbm %s2374_s7, %s1422_s1  ;;  %s1228_s18 = sshll.u32 %s2187_s19, 4  ;;  %s2312_s18 = int_to_ptr.vmem [resolvable:$true] %s1228_s18 }
 0x6c4   : > { %s1194_s15 = scalar_lea.sflag [#allocation10], %s1981_s17  ;;  %s1720_s30 = scalar_lea.vmem %s2312_s18, 2048 }
 0x6c5   : > { %p1721_p7 = scmp.ne.s32.totalorder %s2312_s18, %s1720_s30  ;;  %s1802_s10 = smov [#allocation9]  }
 0x6c6   : > { %s1724_s16 = sshll.u32 %s1802_s10, 4  ;;  %s1725_s16 = int_to_ptr.vmem [resolvable:$false] %s1724_s16 }
 0x6c7   : > { %p1722_p12 = pnand %p1721_p7, %p2395_p2  ;;  %s1726_s9 = scalar_lea.vmem %s1725_s16, 4096 }
 0x6c8   : > { %p1727_p0 = scmp.lt.s32.totalorder %s2312_s18, %s1725_s16  ;;  %p1728_p10 = scmp.lt.s32.totalorder %s1726_s9, %s1720_s30 }
 0x6c9   : > { %p1723_p13 = pneg %p1722_p12 }
 0x6ca   : > { %p1729_p3 = por %p1728_p10, %p1727_p0 }
 0x6cc   : > { %p1730_p11 = pnand %p1729_p3, %p1723_p13 }
 0x6ce   : > { %1733 = shalt.err (!%p1730_p11)
}
 0x6cf   : > { %s1734_s19 = scalar_lea.hbm %s2309_s13, 2048  ;;  %s1738_s22 = scalar_lea.hbm %s2374_s7, 4096 }
 0x6d0   : > { %p1735_p9 = scmp.ne.s32.totalorder %s2309_s13, %s1734_s19  ;;  %p1739_p6 = scmp.lt.s32.totalorder %s2309_s13, %s2374_s7 }
 0x6d1   : > { %p1740_p8 = scmp.lt.s32.totalorder %s1738_s22, %s1734_s19 }
 0x6d2   : > { %p1736_p1 = pnand %p1735_p9, %p2395_p2 }
 0x6d3   : > { %p1741_p5 = por %p1740_p8, %p1739_p6 }
 0x6d4   : > { %p1737_p4 = pneg %p1736_p1 }
 0x6d6   : > { %p1742_p7 = pnand %p1741_p5, %p1737_p4 }
 0x6d8   : > { %1745 = shalt.err (!%p1742_p7)
}
 0x6d9   : > { %s1803_s14 = smov 256   ;;  %s1804_s30 = smov 16   ;;  %vm1150_vm0 = vcmask 7168  }
 0x6da   : > { %1538 = dma.vmem_to_hbm [thread:$0]  (%p2395_p2), %s2312_s18, 2048, %s2309_s13, %s1194_s15, %s1803_s14, %s1803_s14, %s1804_s30  }
 0x6db   : > { %s1391_s10 = sshll.u32 %s1866_s28, 3 }
 0x6dc   : > { %p346_p12 = scmp.lt.s32.totalorder %s1391_s10, 15 }
 0x6de   : > { %s2403_s10 = smov (!%p346_p12, %s1391_s10), 15 }
 0x6df   : > { %s1392_s16 = sshll.u32 %s2403_s10, 3 }
 0x6e0   : > { %s349_s19 = scalar_lea.vmem %s2372_s5, %s1392_s16 }
 0x722   : > { %v1135_v11 = vpop.xlane.xlu0 %1134 }
 0x723   : > { %1151 = vst.msk [vmem:[%s349_s19] sm:$0xff] %vm1150_vm0, %v1135_v11 }
 0x726   : > { %v1137_v15 = vpop.xlane.xlu1 %1136 }
 0x727   : > { %1152 = vst.msk [vmem:[%s349_s19 + $0x8] sm:$0xff] %vm1150_vm0, %v1137_v15 }
 0x72a   : > { %v1139_v14 = vpop.xlane.xlu0 %1138 }
 0x72b   : > { %1153 = vst.msk [vmem:[%s349_s19 + $0x10] sm:$0xff] %vm1150_vm0, %v1139_v14 }
 0x72e   : > { %v1141_v12 = vpop.xlane.xlu1 %1140 }
 0x72f   : > { %1154 = vst.msk [vmem:[%s349_s19 + $0x18] sm:$0xff] %vm1150_vm0, %v1141_v12 }
 0x732   : > { %v1143_v20 = vpop.xlane.xlu0 %1142 }
 0x733   : > { %1155 = vst.msk [vmem:[%s349_s19 + $0x20] sm:$0xff] %vm1150_vm0, %v1143_v20 }
 0x736   : > { %v1145_v19 = vpop.xlane.xlu1 %1144 }
 0x737   : > { %1156 = vst.msk [vmem:[%s349_s19 + $0x28] sm:$0xff] %vm1150_vm0, %v1145_v19 }
 0x73a   : > { %v1147_v17 = vpop.xlane.xlu0 %1146 }
 0x73b   : > { %1157 = vst.msk [vmem:[%s349_s19 + $0x30] sm:$0xff] %vm1150_vm0, %v1147_v17 }
 0x73e   : > { %v1149_v25 = vpop.xlane.xlu1 %1148 }
 0x73f   : > { %1158 = vst.msk [vmem:[%s349_s19 + $0x38] sm:$0xff] %vm1150_vm0, %v1149_v25 }
 0x740 PF: > { %s1251_s28 = sand.u32 1, %s1780_s24   ;;  %p2396_p2 = scmp.ne.s32.totalorder %s2383_s8, 0 }
 0x741   : > { %p2397_p13 = scmp.ge.s32.totalorder %s1792_s27, 2  ;;  %s1252_s11 = scalar_lea.sflag [#allocation4], %s1251_s28 }
 0x743   : > { %p1553_p0 = pnand %p2397_p13, %p2396_p2 }
 0x745   : > { %p1554_p10 = pneg %p1553_p0 }
 0x747   : > { %1771 = dma.done.wait (%p1554_p10), %s1252_s11, 1024  }
 0x748   : > { %1773 = vsyncadd (%p1554_p10), %s1252_s11, 4294966272  ;;  %s1261_s17 = scalar_lea.sflag [#allocation10], %s1251_s28 }
 0x749   : > { %1775 = dma.done.wait (%p1554_p10), %s1261_s17, 2048  }
 0x74a   : > { %1777 = vsyncadd (%p1554_p10), %s1261_s17, 4294965248  ;;  %p25_p3 = scmp.ge.s32.totalorder %s1923_s23, 4   ;;  %s2398_s24 = smov %s1784_s25 }
 0x74b   : > { %s2399_s25 = smov %s1788_s26  ;;  %s2400_s26 = smov %s1939_s12 }
 0x74c   : > { %s2401_s27 = smov %s1923_s23  ;;  %27 = sbr.rel (!%p25_p3) target bundleno = 10 (0xa), region = 122 }
 0x751   :  { %1266 = vsyncpa [#allocation3], 1 }
 0x752   :  { %1268 = vsyncpa [#allocation3 + $0x1], 1 }
 0x753   :  { %1269 = vsyncpa [#allocation6], 1 }
 0x754   :  { %1270 = vsyncpa [#allocation4], 1 }
 0x755   :  { %1272 = vsyncpa [#allocation4 + $0x1], 1 }
 0x756   :  { %1273 = vsyncpa [#allocation10], 1 }
 0x757   :  { %1275 = vsyncpa [#allocation10 + $0x1], 1 }

</bundles_post_ra>
